<compile_context>
chip_gen: v7x
topology: tpu7x:2x2x1
jax: 0.10.0
libtpu: 0.0.40
codegen_flags: <defaults>
</compile_context>

<pallas_src>
import math

import jax
import jax.numpy as jnp
from jax import lax
from jax.experimental import pallas as pl
from jax.experimental.pallas import tpu as pltpu

NUM_HEADS = 2   # d2l.MultiHeadAttention(num_heads=2)
LANE = 128


def _joint_kpe_kernel(
    vl_ref,        # (NB, 1)  int32 VMEM — valid word counts of this batch block
    x_ref,         # (NB, W, H) f32   — padded word embeddings
    wqkv_ref,      # (H, 6*HH) bf16   — [Wq1|Wk1|Wv1|Wq2|Wk2|Wv2]
    wo_ref,        # (2, HH, HH) bf16 — output projections of attention_1/2
    wgA_ref,       # (4, W, HH) f32   — gate planes hitting atten_1: [mark_c0, mark_c1, rank_c0, rank_c1]
    wgB_ref,       # (4, W, HH) f32   — gate planes hitting atten_2
    bg_ref,        # (4,) f32 SMEM    — gate biases [mark_c0, mark_c1, rank_c0, rank_c1]
    whead_ref,     # (2, HH, LP) bf16 — plane 0: classifier -> cols [0,L); plane 1: score -> col L
    bhead_ref,     # (1, LP) f32      — fused head bias
    out_ref,       # (NB, W, LP) f32  — fused output (mark cols [0,L), score col L)
):
    NB, W, H = x_ref.shape
    HH = wo_ref.shape[2]
    hd = HH // NUM_HEADS
    LP = whead_ref.shape[2]

    # ---- fused QKV projection for both attention modules (one wide MXU matmul) ----
    xb = x_ref[...].reshape(NB * W, H).astype(jnp.bfloat16)
    proj = jnp.dot(xb, wqkv_ref[...], preferred_element_type=jnp.float32)   # (NB*W, 6*HH)

    # d2l masked_softmax: key positions >= valid_len get -1e6 before softmax.
    vl = vl_ref[...].reshape(NB, 1, 1)
    key_pos = lax.broadcasted_iota(jnp.int32, (NB, W, W), 2)
    valid = key_pos < vl
    inv_sqrt_hd = jnp.float32(1.0 / math.sqrt(hd))

    def attention(m):
        q = proj[:, (3 * m + 0) * HH:(3 * m + 1) * HH].reshape(NB, W, HH)
        k = proj[:, (3 * m + 1) * HH:(3 * m + 2) * HH].reshape(NB, W, HH)
        v = proj[:, (3 * m + 2) * HH:(3 * m + 3) * HH].reshape(NB, W, HH)
        ctx_heads = []
        for h in range(NUM_HEADS):
            qh = q[:, :, h * hd:(h + 1) * hd].astype(jnp.bfloat16)
            kh = k[:, :, h * hd:(h + 1) * hd].astype(jnp.bfloat16)
            vh = v[:, :, h * hd:(h + 1) * hd].astype(jnp.bfloat16)
            scores = jnp.einsum('bqd,bkd->bqk', qh, kh,
                                preferred_element_type=jnp.float32) * inv_sqrt_hd
            scores = jnp.where(valid, scores, jnp.float32(-1e6))
            mmax = jnp.max(scores, axis=-1, keepdims=True)
            e = jnp.exp(scores - mmax)
            attn = e * pl.reciprocal(jnp.sum(e, axis=-1, keepdims=True), approx=True)
            # TODO(synk): attention-weight / hidden dropout skipped (eval-mode identity).
            ctx_heads.append(jnp.einsum('bqk,bkd->bqd', attn.astype(jnp.bfloat16), vh,
                                        preferred_element_type=jnp.float32))
        ctx = jnp.concatenate(ctx_heads, axis=-1)                           # (NB, W, HH)
        ctx2 = ctx.reshape(NB * W, HH).astype(jnp.bfloat16)
        out = jnp.dot(ctx2, wo_ref[m], preferred_element_type=jnp.float32)  # single wide W_o matmul
        return out.reshape(NB, W, HH)

    a1 = attention(0)    # atten_1[b]  (NB, W, HH)
    a2 = attention(1)    # atten_2[b]

    # ---- mark/rank gates: 4 logits, each one fused MAC + one two-stage reduction ----
    def logit(g):
        prod = a1 * wgA_ref[g][None] + a2 * wgB_ref[g][None]                # (NB, W, HH)
        z = jnp.sum(jnp.sum(prod, axis=2, keepdims=True), axis=1, keepdims=True)
        return z + bg_ref[g]                                                # (NB, 1, 1)

    zm0, zm1, zr0, zr1 = logit(0), logit(1), logit(2), logit(3)

    def softmax2(z0, z1):
        m = jnp.maximum(z0, z1)
        e0, e1 = jnp.exp(z0 - m), jnp.exp(z1 - m)
        inv = pl.reciprocal(e0 + e1, approx=True)
        return e0 * inv, e1 * inv

    gm0, gm1 = softmax2(zm0, zm1)
    gr0, gr1 = softmax2(zr0, zr1)

    # bmm(g.unsqueeze(1), atten.view(B,2,-1)).view(...)  ==  g0*atten_1 + g1*atten_2
    atten_mark = gm0 * a1 + gm1 * a2                                        # (NB, W, HH)
    atten_rank = gr0 * a1 + gr1 * a2

    # ---- fused, lane-dense classifier + score head ----
    am = atten_mark.reshape(NB * W, HH).astype(jnp.bfloat16)
    ar = atten_rank.reshape(NB * W, HH).astype(jnp.bfloat16)
    fused = (jnp.dot(am, whead_ref[0], preferred_element_type=jnp.float32)
             + jnp.dot(ar, whead_ref[1], preferred_element_type=jnp.float32)
             + bhead_ref[...])
    out_ref[...] = fused.reshape(NB, W, LP)


def joint_kpe_forward(batch_word_em, batch_word_len, params, *, nb=None):
    """Pallas-backed forward. Returns (batch_mark_list (B,W,L), batch_score_list (B,W,1))."""
    B, W, H = batch_word_em.shape
    HH = params["wq1"].shape[1]
    L = params["wc"].shape[1]
    assert HH % NUM_HEADS == 0
    LP = pl.cdiv(L + 1, LANE) * LANE          # lane-dense fused head width (mark cols + score col)

    # batches per grid step: amortizes per-step overhead and fills MXU M dimension
    if nb is None:
        nb = B if B <= 8 else 8
    Bp = pl.cdiv(B, nb) * nb

    x = batch_word_em.astype(jnp.float32)
    vl = batch_word_len.astype(jnp.int32)
    if Bp != B:
        x = jnp.pad(x, ((0, Bp - B), (0, 0), (0, 0)))
        vl = jnp.pad(vl, ((0, Bp - B),))
    vl = vl.reshape(Bp, 1)

    # ---- weight prep (bf16 MXU operands, fused layouts) ----
    wqkv = jnp.concatenate(
        [params["wq1"], params["wk1"], params["wv1"],
         params["wq2"], params["wk2"], params["wv2"]], axis=1).astype(jnp.bfloat16)  # (H, 6HH)
    wo = jnp.stack([params["wo1"], params["wo2"]], axis=0).astype(jnp.bfloat16)      # (2, HH, HH)

    def gate_planes(wg):  # wg: (2*W*HH, 2); flat index = module*W*HH + w*HH + h
        wg_r = wg.reshape(2, W, HH, 2)
        pA = jnp.stack([wg_r[0, :, :, 0], wg_r[0, :, :, 1]], axis=0)   # (2, W, HH) vs atten_1
        pB = jnp.stack([wg_r[1, :, :, 0], wg_r[1, :, :, 1]], axis=0)   # (2, W, HH) vs atten_2
        return pA, pB

    pAm, pBm = gate_planes(params["w_mark_gate"])
    pAr, pBr = gate_planes(params["w_rank_gate"])
    wgA = jnp.concatenate([pAm, pAr], axis=0).astype(jnp.float32)      # (4, W, HH)
    wgB = jnp.concatenate([pBm, pBr], axis=0).astype(jnp.float32)
    bg = jnp.concatenate([params["b_mark_gate"], params["b_rank_gate"]]).astype(jnp.float32)  # (4,)

    whead = jnp.zeros((2, HH, LP), jnp.float32)
    whead = whead.at[0, :, :L].set(params["wc"])
    whead = whead.at[1, :, L].set(params["ws"][:, 0])
    whead = whead.astype(jnp.bfloat16)
    bhead = jnp.zeros((1, LP), jnp.float32)
    bhead = bhead.at[0, :L].set(params["bc"])
    bhead = bhead.at[0, L].set(params["bs"][0])

    def const_spec(shape):
        n = len(shape)
        return pl.BlockSpec(shape, lambda i, _n=n: (0,) * _n)

    in_specs = [
        pl.BlockSpec((nb, 1), lambda i: (i, 0)),                       # valid lengths
        pl.BlockSpec((nb, W, H), lambda i: (i, 0, 0)),                 # word embeddings
        const_spec((H, 6 * HH)),                                       # fused QKV weights
        const_spec((2, HH, HH)),                                       # output projections
        const_spec((4, W, HH)),                                        # gate planes vs atten_1
        const_spec((4, W, HH)),                                        # gate planes vs atten_2
        pl.BlockSpec(memory_space=pltpu.MemorySpace.SMEM),             # gate biases (scalars)
        const_spec((2, HH, LP)),                                       # fused head weights
        const_spec((1, LP)),                                           # fused head bias
    ]
    out_specs = pl.BlockSpec((nb, W, LP), lambda i: (i, 0, 0))
    out_shape = jax.ShapeDtypeStruct((Bp, W, LP), jnp.float32)

    grid_spec = pltpu.PrefetchScalarGridSpec(
        num_scalar_prefetch=0, grid=(Bp // nb,),
        in_specs=in_specs, out_specs=out_specs)

    fused_out = pl.pallas_call(
        _joint_kpe_kernel,
        out_shape=out_shape,
        grid_spec=grid_spec,
        compiler_params=pltpu.CompilerParams(
            dimension_semantics=("parallel",),           # batch steps are independent (v7x 2 TCs)
            vmem_limit_bytes=48 * 1024 * 1024),
    )(vl, x, wqkv, wo, wgA, wgB, bg, whead, bhead)

    mark = fused_out[:B, :, :L]
    score = fused_out[:B, :, L:L + 1]
    return mark, score


# ----------------------- deterministic synthetic parameters -----------------------
def init_params(key, H, HH, W, L):
    ks = jax.random.split(key, 16)

    def w(k, shape, scale=0.05):
        return jax.random.normal(k, shape, jnp.float32) * scale

    p = {}
    # d2l MultiHeadAttention: W_q/W_k/W_v/W_o are bias-free linears.
    p["wq1"], p["wk1"], p["wv1"], p["wo1"] = w(ks[0], (H, HH)), w(ks[1], (H, HH)), w(ks[2], (H, HH)), w(ks[3], (HH, HH))
    p["wq2"], p["wk2"], p["wv2"], p["wo2"] = w(ks[4], (H, HH)), w(ks[5], (H, HH)), w(ks[6], (H, HH)), w(ks[7], (HH, HH))
    # mark_gate / rank_gate: Linear(max_word_count * atten_hidden_size * 2, 2)
    p["w_mark_gate"], p["b_mark_gate"] = w(ks[8], (2 * W * HH, 2)), w(ks[9], (2,))
    p["w_rank_gate"], p["b_rank_gate"] = w(ks[10], (2 * W * HH, 2)), w(ks[11], (2,))
    # classifier: Linear(atten_hidden_size, num_labels); score: Linear(atten_hidden_size, 1)
    p["wc"], p["bc"] = w(ks[12], (HH, L)), w(ks[13], (L,))
    p["ws"], p["bs"] = w(ks[14], (HH, 1)), w(ks[15], (1,))
    return p


# ----------------------- pure-JAX f32 reference (semantic check) -----------------------
def reference_forward(x, valid_len, p):
    B, W, H = x.shape
    HH = p["wq1"].shape[1]
    hd = HH // NUM_HEADS

    def mha(x, wq, wk, wv, wo):
        q, k, v = x @ wq, x @ wk, x @ wv                       # (B, W, HH)
        split = lambda t: t.reshape(B, W, NUM_HEADS, hd).transpose(0, 2, 1, 3)
        qh, kh, vh = split(q), split(k), split(v)              # (B, heads, W, hd)
        scores = jnp.einsum("bhqd,bhkd->bhqk", qh, kh) / jnp.sqrt(jnp.float32(hd))
        mask = jnp.arange(W)[None, None, None, :] < valid_len[:, None, None, None]
        scores = jnp.where(mask, scores, -1e6)
        attn = jax.nn.softmax(scores, axis=-1)
        ctx = jnp.einsum("bhqk,bhkd->bhqd", attn, vh)
        ctx = ctx.transpose(0, 2, 1, 3).reshape(B, W, HH)
        return ctx @ wo

    a1 = mha(x, p["wq1"], p["wk1"], p["wv1"], p["wo1"])
    a2 = mha(x, p["wq2"], p["wk2"], p["wv2"], p["wo2"])
    atten = jnp.stack([a1, a2], axis=1)                        # (B, 2, W, HH)
    flat = atten.reshape(B, -1)
    mark_g = jax.nn.softmax(flat @ p["w_mark_gate"] + p["b_mark_gate"], axis=1)
    rank_g = jax.nn.softmax(flat @ p["w_rank_gate"] + p["b_rank_gate"], axis=1)
    atten_v = atten.reshape(B, 2, -1)
    atten_mark = jnp.einsum("bc,bcd->bd", mark_g, atten_v).reshape(B, W, HH)
    atten_rank = jnp.einsum("bc,bcd->bd", rank_g, atten_v).reshape(B, W, HH)
    mark = atten_mark @ p["wc"] + p["bc"]
    score = atten_rank @ p["ws"] + p["bs"]
    return mark, score


if __name__ == "__main__":
    # small synthetic config: batch=2, max_word_count=8, hidden=atten_hidden=32, num_labels=5
    B, W, H, HH, L = 2, 8, 32, 32, 5
    key = jax.random.PRNGKey(0)
    kx, kp = jax.random.split(key)

    x = jax.random.normal(kx, (B, W, H), jnp.float32)
    valid_len = jnp.array([5, 8], dtype=jnp.int32)             # batch_word_len
    # emulate F.pad zero-padding of word embeddings beyond each sample's word count
    pos = jnp.arange(W)[None, :, None]
    x = jnp.where(pos < valid_len[:, None, None], x, 0.0)

    params = init_params(kp, H, HH, W, L)

    mark, score = joint_kpe_forward(x, valid_len, params)
    mark, score = jax.block_until_ready((mark, score))

    mark_ref, score_ref = reference_forward(x, valid_len, params)
    assert mark.shape == (B, W, L) and score.shape == (B, W, 1)
    # bf16 MXU operands + approx EUP reciprocal -> slightly looser tolerance vs f32 reference
    assert jnp.allclose(mark, mark_ref, atol=2e-2, rtol=2e-2), float(jnp.max(jnp.abs(mark - mark_ref)))
    assert jnp.allclose(score, score_ref, atol=2e-2, rtol=2e-2), float(jnp.max(jnp.abs(score - score_ref)))
    print("KERNEL_OK")
</pallas_src>

<mosaic_0001>
module attributes {stable_mosaic.version = 11 : i64} {
  func.func @_joint_kpe_kernel(%arg0: i32, %arg1: memref<2x1xi32, #tpu.memory_space<vmem>>, %arg2: memref<2x8x32xf32, #tpu.memory_space<vmem>>, %arg3: memref<32x192xbf16, #tpu.memory_space<vmem>>, %arg4: memref<2x32x32xbf16, #tpu.memory_space<vmem>>, %arg5: memref<4x8x32xf32, #tpu.memory_space<vmem>>, %arg6: memref<4x8x32xf32, #tpu.memory_space<vmem>>, %arg7: memref<4xf32, #tpu.memory_space<smem>>, %arg8: memref<2x32x128xbf16, #tpu.memory_space<vmem>>, %arg9: memref<1x128xf32, #tpu.memory_space<vmem>>, %arg10: memref<2x8x128xf32, #tpu.memory_space<vmem>>) attributes {dimension_semantics = [#tpu.dimension_semantics<parallel>], iteration_bounds = array<i64: 1>, scalar_prefetch = 0 : i64, scratch_operands = 0 : i64, tpu.core_type = #tpu.core_type<tc>, window_params = [{transform_indices = @transform_0, window_bounds = array<i64: 2, 1>}, {transform_indices = @transform_1, window_bounds = array<i64: 2, 8, 32>}, {pipeline_mode = #tpu.pipeline_mode<synchronous>, transform_indices = @transform_2, window_bounds = array<i64: 32, 192>}, {pipeline_mode = #tpu.pipeline_mode<synchronous>, transform_indices = @transform_3, window_bounds = array<i64: 2, 32, 32>}, {pipeline_mode = #tpu.pipeline_mode<synchronous>, transform_indices = @transform_4, window_bounds = array<i64: 4, 8, 32>}, {pipeline_mode = #tpu.pipeline_mode<synchronous>, transform_indices = @transform_5, window_bounds = array<i64: 4, 8, 32>}, {transform_indices = @transform_6, window_bounds = array<i64: 4>}, {pipeline_mode = #tpu.pipeline_mode<synchronous>, transform_indices = @transform_7, window_bounds = array<i64: 2, 32, 128>}, {pipeline_mode = #tpu.pipeline_mode<synchronous>, transform_indices = @transform_8, window_bounds = array<i64: 1, 128>}, {transform_indices = @transform_9, window_bounds = array<i64: 2, 8, 128>}]} {
    %c0 = arith.constant 0 : index
    %c0_0 = arith.constant 0 : index
    %c0_1 = arith.constant 0 : index
    %0 = vector.load %arg2[%c0, %c0_0, %c0_1] : memref<2x8x32xf32, #tpu.memory_space<vmem>>, vector<2x8x32xf32>
    %1 = vector.shape_cast %0 : vector<2x8x32xf32> to vector<16x32xf32>
    %2 = arith.truncf %1 : vector<16x32xf32> to vector<16x32xbf16>
    %c0_2 = arith.constant 0 : index
    %c0_3 = arith.constant 0 : index
    %3 = vector.load %arg3[%c0_2, %c0_3] : memref<32x192xbf16, #tpu.memory_space<vmem>>, vector<32x192xbf16>
    %cst = arith.constant dense<0.000000e+00> : vector<16x192xf32>
    %4 = tpu.matmul %2, %3, %cst {dimension_numbers = #tpu.dot_dimension_numbers<[1], [0], [0], [1], [0, 0, 1, 1], [], []>} : vector<16x32xbf16>, vector<32x192xbf16>, vector<16x192xf32> -> vector<16x192xf32>
    %c0_4 = arith.constant 0 : index
    %c0_5 = arith.constant 0 : index
    %5 = vector.load %arg1[%c0_4, %c0_5] : memref<2x1xi32, #tpu.memory_space<vmem>>, vector<2x1xi32>
    %6 = vector.shape_cast %5 : vector<2x1xi32> to vector<2x1x1xi32>
    %7 = tpu.iota {dimensions = array<i32: 2>} : vector<2x8x8xi32>
    %8 = vector.broadcast %6 : vector<2x1x1xi32> to vector<2x8x8xi32>
    %9 = arith.cmpi slt, %7, %8 : vector<2x8x8xi32>
    %10 = vector.extract_strided_slice %4 {offsets = [0, 0], sizes = [16, 32], strides = [1, 1]} : vector<16x192xf32> to vector<16x32xf32>
    %11 = vector.shape_cast %10 : vector<16x32xf32> to vector<2x8x32xf32>
    %12 = vector.extract_strided_slice %4 {offsets = [0, 32], sizes = [16, 32], strides = [1, 1]} : vector<16x192xf32> to vector<16x32xf32>
    %13 = vector.shape_cast %12 : vector<16x32xf32> to vector<2x8x32xf32>
    %14 = vector.extract_strided_slice %4 {offsets = [0, 64], sizes = [16, 32], strides = [1, 1]} : vector<16x192xf32> to vector<16x32xf32>
    %15 = vector.shape_cast %14 : vector<16x32xf32> to vector<2x8x32xf32>
    %16 = vector.extract_strided_slice %11 {offsets = [0, 0, 0], sizes = [2, 8, 16], strides = [1, 1, 1]} : vector<2x8x32xf32> to vector<2x8x16xf32>
    %17 = arith.truncf %16 : vector<2x8x16xf32> to vector<2x8x16xbf16>
    %18 = vector.extract_strided_slice %13 {offsets = [0, 0, 0], sizes = [2, 8, 16], strides = [1, 1, 1]} : vector<2x8x32xf32> to vector<2x8x16xf32>
    %19 = arith.truncf %18 : vector<2x8x16xf32> to vector<2x8x16xbf16>
    %20 = vector.extract_strided_slice %15 {offsets = [0, 0, 0], sizes = [2, 8, 16], strides = [1, 1, 1]} : vector<2x8x32xf32> to vector<2x8x16xf32>
    %21 = arith.truncf %20 : vector<2x8x16xf32> to vector<2x8x16xbf16>
    "tpu.trace_start"() <{level = 10 : i32, message = "bqd,bkd->bqk"}> : () -> ()
    %cst_6 = arith.constant dense<0.000000e+00> : vector<2x8x8xf32>
    %22 = tpu.matmul %17, %19, %cst_6 {dimension_numbers = #tpu.dot_dimension_numbers<[2], [2], [1], [1], [0, 0, 0, 1, 1, 1], [0], [0]>} : vector<2x8x16xbf16>, vector<2x8x16xbf16>, vector<2x8x8xf32> -> vector<2x8x8xf32>
    "tpu.trace_stop"() : () -> ()
    %cst_7 = arith.constant 2.500000e-01 : f32
    %23 = vector.broadcast %cst_7 : f32 to vector<2x8x8xf32>
    %24 = arith.mulf %22, %23 : vector<2x8x8xf32>
    %cst_8 = arith.constant -1.000000e+06 : f32
    %25 = vector.broadcast %cst_8 : f32 to vector<2x8x8xf32>
    %26 = arith.select %9, %24, %25 : vector<2x8x8xi1>, vector<2x8x8xf32>
    %cst_9 = arith.constant dense<0xFF800000> : vector<2x8xf32>
    %27 = vector.multi_reduction <maximumf>, %26, %cst_9 [2] : vector<2x8x8xf32> to vector<2x8xf32>
    %28 = vector.shape_cast %27 : vector<2x8xf32> to vector<2x8x1xf32>
    %29 = vector.broadcast %28 : vector<2x8x1xf32> to vector<2x8x8xf32>
    %30 = arith.subf %26, %29 : vector<2x8x8xf32>
    %31 = math.exp %30 : vector<2x8x8xf32>
    %cst_10 = arith.constant dense<0.000000e+00> : vector<2x8xf32>
    %32 = vector.multi_reduction <add>, %31, %cst_10 [2] : vector<2x8x8xf32> to vector<2x8xf32>
    %33 = vector.shape_cast %32 : vector<2x8xf32> to vector<2x8x1xf32>
    %34 = tpu.reciprocal %33 {approx = true} : vector<2x8x1xf32> -> vector<2x8x1xf32>
    %35 = vector.broadcast %34 : vector<2x8x1xf32> to vector<2x8x8xf32>
    %36 = arith.mulf %31, %35 : vector<2x8x8xf32>
    %37 = arith.truncf %36 : vector<2x8x8xf32> to vector<2x8x8xbf16>
    "tpu.trace_start"() <{level = 10 : i32, message = "bqk,bkd->bqd"}> : () -> ()
    %cst_11 = arith.constant dense<0.000000e+00> : vector<2x8x16xf32>
    %38 = tpu.matmul %37, %21, %cst_11 {dimension_numbers = #tpu.dot_dimension_numbers<[2], [1], [1], [2], [0, 0, 0, 1, 1, 2], [0], [0]>} : vector<2x8x8xbf16>, vector<2x8x16xbf16>, vector<2x8x16xf32> -> vector<2x8x16xf32>
    "tpu.trace_stop"() : () -> ()
    %39 = vector.extract_strided_slice %11 {offsets = [0, 0, 16], sizes = [2, 8, 16], strides = [1, 1, 1]} : vector<2x8x32xf32> to vector<2x8x16xf32>
    %40 = arith.truncf %39 : vector<2x8x16xf32> to vector<2x8x16xbf16>
    %41 = vector.extract_strided_slice %13 {offsets = [0, 0, 16], sizes = [2, 8, 16], strides = [1, 1, 1]} : vector<2x8x32xf32> to vector<2x8x16xf32>
    %42 = arith.truncf %41 : vector<2x8x16xf32> to vector<2x8x16xbf16>
    %43 = vector.extract_strided_slice %15 {offsets = [0, 0, 16], sizes = [2, 8, 16], strides = [1, 1, 1]} : vector<2x8x32xf32> to vector<2x8x16xf32>
    %44 = arith.truncf %43 : vector<2x8x16xf32> to vector<2x8x16xbf16>
    "tpu.trace_start"() <{level = 10 : i32, message = "bqd,bkd->bqk"}> : () -> ()
    %cst_12 = arith.constant dense<0.000000e+00> : vector<2x8x8xf32>
    %45 = tpu.matmul %40, %42, %cst_12 {dimension_numbers = #tpu.dot_dimension_numbers<[2], [2], [1], [1], [0, 0, 0, 1, 1, 1], [0], [0]>} : vector<2x8x16xbf16>, vector<2x8x16xbf16>, vector<2x8x8xf32> -> vector<2x8x8xf32>
    "tpu.trace_stop"() : () -> ()
    %cst_13 = arith.constant 2.500000e-01 : f32
    %46 = vector.broadcast %cst_13 : f32 to vector<2x8x8xf32>
    %47 = arith.mulf %45, %46 : vector<2x8x8xf32>
    %cst_14 = arith.constant -1.000000e+06 : f32
    %48 = vector.broadcast %cst_14 : f32 to vector<2x8x8xf32>
    %49 = arith.select %9, %47, %48 : vector<2x8x8xi1>, vector<2x8x8xf32>
    %cst_15 = arith.constant dense<0xFF800000> : vector<2x8xf32>
    %50 = vector.multi_reduction <maximumf>, %49, %cst_15 [2] : vector<2x8x8xf32> to vector<2x8xf32>
    %51 = vector.shape_cast %50 : vector<2x8xf32> to vector<2x8x1xf32>
    %52 = vector.broadcast %51 : vector<2x8x1xf32> to vector<2x8x8xf32>
    %53 = arith.subf %49, %52 : vector<2x8x8xf32>
    %54 = math.exp %53 : vector<2x8x8xf32>
    %cst_16 = arith.constant dense<0.000000e+00> : vector<2x8xf32>
    %55 = vector.multi_reduction <add>, %54, %cst_16 [2] : vector<2x8x8xf32> to vector<2x8xf32>
    %56 = vector.shape_cast %55 : vector<2x8xf32> to vector<2x8x1xf32>
    %57 = tpu.reciprocal %56 {approx = true} : vector<2x8x1xf32> -> vector<2x8x1xf32>
    %58 = vector.broadcast %57 : vector<2x8x1xf32> to vector<2x8x8xf32>
    %59 = arith.mulf %54, %58 : vector<2x8x8xf32>
    %60 = arith.truncf %59 : vector<2x8x8xf32> to vector<2x8x8xbf16>
    "tpu.trace_start"() <{level = 10 : i32, message = "bqk,bkd->bqd"}> : () -> ()
    %cst_17 = arith.constant dense<0.000000e+00> : vector<2x8x16xf32>
    %61 = tpu.matmul %60, %44, %cst_17 {dimension_numbers = #tpu.dot_dimension_numbers<[2], [1], [1], [2], [0, 0, 0, 1, 1, 2], [0], [0]>} : vector<2x8x8xbf16>, vector<2x8x16xbf16>, vector<2x8x16xf32> -> vector<2x8x16xf32>
    "tpu.trace_stop"() : () -> ()
    %62 = tpu.concatenate %38, %61 in 2 : vector<2x8x16xf32>, vector<2x8x16xf32> -> vector<2x8x32xf32>
    %63 = vector.shape_cast %62 : vector<2x8x32xf32> to vector<16x32xf32>
    %64 = arith.truncf %63 : vector<16x32xf32> to vector<16x32xbf16>
    %c0_18 = arith.constant 0 : index
    %c0_19 = arith.constant 0 : index
    %c0_20 = arith.constant 0 : index
    %65 = vector.load %arg4[%c0_18, %c0_19, %c0_20] : memref<2x32x32xbf16, #tpu.memory_space<vmem>>, vector<1x32x32xbf16>
    %66 = vector.shape_cast %65 : vector<1x32x32xbf16> to vector<32x32xbf16>
    %cst_21 = arith.constant dense<0.000000e+00> : vector<16x32xf32>
    %67 = tpu.matmul %64, %66, %cst_21 {dimension_numbers = #tpu.dot_dimension_numbers<[1], [0], [0], [1], [0, 0, 1, 1], [], []>} : vector<16x32xbf16>, vector<32x32xbf16>, vector<16x32xf32> -> vector<16x32xf32>
    %68 = vector.shape_cast %67 : vector<16x32xf32> to vector<2x8x32xf32>
    %69 = vector.extract_strided_slice %4 {offsets = [0, 96], sizes = [16, 32], strides = [1, 1]} : vector<16x192xf32> to vector<16x32xf32>
    %70 = vector.shape_cast %69 : vector<16x32xf32> to vector<2x8x32xf32>
    %71 = vector.extract_strided_slice %4 {offsets = [0, 128], sizes = [16, 32], strides = [1, 1]} : vector<16x192xf32> to vector<16x32xf32>
    %72 = vector.shape_cast %71 : vector<16x32xf32> to vector<2x8x32xf32>
    %73 = vector.extract_strided_slice %4 {offsets = [0, 160], sizes = [16, 32], strides = [1, 1]} : vector<16x192xf32> to vector<16x32xf32>
    %74 = vector.shape_cast %73 : vector<16x32xf32> to vector<2x8x32xf32>
    %75 = vector.extract_strided_slice %70 {offsets = [0, 0, 0], sizes = [2, 8, 16], strides = [1, 1, 1]} : vector<2x8x32xf32> to vector<2x8x16xf32>
    %76 = arith.truncf %75 : vector<2x8x16xf32> to vector<2x8x16xbf16>
    %77 = vector.extract_strided_slice %72 {offsets = [0, 0, 0], sizes = [2, 8, 16], strides = [1, 1, 1]} : vector<2x8x32xf32> to vector<2x8x16xf32>
    %78 = arith.truncf %77 : vector<2x8x16xf32> to vector<2x8x16xbf16>
    %79 = vector.extract_strided_slice %74 {offsets = [0, 0, 0], sizes = [2, 8, 16], strides = [1, 1, 1]} : vector<2x8x32xf32> to vector<2x8x16xf32>
    %80 = arith.truncf %79 : vector<2x8x16xf32> to vector<2x8x16xbf16>
    "tpu.trace_start"() <{level = 10 : i32, message = "bqd,bkd->bqk"}> : () -> ()
    %cst_22 = arith.constant dense<0.000000e+00> : vector<2x8x8xf32>
    %81 = tpu.matmul %76, %78, %cst_22 {dimension_numbers = #tpu.dot_dimension_numbers<[2], [2], [1], [1], [0, 0, 0, 1, 1, 1], [0], [0]>} : vector<2x8x16xbf16>, vector<2x8x16xbf16>, vector<2x8x8xf32> -> vector<2x8x8xf32>
    "tpu.trace_stop"() : () -> ()
    %cst_23 = arith.constant 2.500000e-01 : f32
    %82 = vector.broadcast %cst_23 : f32 to vector<2x8x8xf32>
    %83 = arith.mulf %81, %82 : vector<2x8x8xf32>
    %cst_24 = arith.constant -1.000000e+06 : f32
    %84 = vector.broadcast %cst_24 : f32 to vector<2x8x8xf32>
    %85 = arith.select %9, %83, %84 : vector<2x8x8xi1>, vector<2x8x8xf32>
    %cst_25 = arith.constant dense<0xFF800000> : vector<2x8xf32>
    %86 = vector.multi_reduction <maximumf>, %85, %cst_25 [2] : vector<2x8x8xf32> to vector<2x8xf32>
    %87 = vector.shape_cast %86 : vector<2x8xf32> to vector<2x8x1xf32>
    %88 = vector.broadcast %87 : vector<2x8x1xf32> to vector<2x8x8xf32>
    %89 = arith.subf %85, %88 : vector<2x8x8xf32>
    %90 = math.exp %89 : vector<2x8x8xf32>
    %cst_26 = arith.constant dense<0.000000e+00> : vector<2x8xf32>
    %91 = vector.multi_reduction <add>, %90, %cst_26 [2] : vector<2x8x8xf32> to vector<2x8xf32>
    %92 = vector.shape_cast %91 : vector<2x8xf32> to vector<2x8x1xf32>
    %93 = tpu.reciprocal %92 {approx = true} : vector<2x8x1xf32> -> vector<2x8x1xf32>
    %94 = vector.broadcast %93 : vector<2x8x1xf32> to vector<2x8x8xf32>
    %95 = arith.mulf %90, %94 : vector<2x8x8xf32>
    %96 = arith.truncf %95 : vector<2x8x8xf32> to vector<2x8x8xbf16>
    "tpu.trace_start"() <{level = 10 : i32, message = "bqk,bkd->bqd"}> : () -> ()
    %cst_27 = arith.constant dense<0.000000e+00> : vector<2x8x16xf32>
    %97 = tpu.matmul %96, %80, %cst_27 {dimension_numbers = #tpu.dot_dimension_numbers<[2], [1], [1], [2], [0, 0, 0, 1, 1, 2], [0], [0]>} : vector<2x8x8xbf16>, vector<2x8x16xbf16>, vector<2x8x16xf32> -> vector<2x8x16xf32>
    "tpu.trace_stop"() : () -> ()
    %98 = vector.extract_strided_slice %70 {offsets = [0, 0, 16], sizes = [2, 8, 16], strides = [1, 1, 1]} : vector<2x8x32xf32> to vector<2x8x16xf32>
    %99 = arith.truncf %98 : vector<2x8x16xf32> to vector<2x8x16xbf16>
    %100 = vector.extract_strided_slice %72 {offsets = [0, 0, 16], sizes = [2, 8, 16], strides = [1, 1, 1]} : vector<2x8x32xf32> to vector<2x8x16xf32>
    %101 = arith.truncf %100 : vector<2x8x16xf32> to vector<2x8x16xbf16>
    %102 = vector.extract_strided_slice %74 {offsets = [0, 0, 16], sizes = [2, 8, 16], strides = [1, 1, 1]} : vector<2x8x32xf32> to vector<2x8x16xf32>
    %103 = arith.truncf %102 : vector<2x8x16xf32> to vector<2x8x16xbf16>
    "tpu.trace_start"() <{level = 10 : i32, message = "bqd,bkd->bqk"}> : () -> ()
    %cst_28 = arith.constant dense<0.000000e+00> : vector<2x8x8xf32>
    %104 = tpu.matmul %99, %101, %cst_28 {dimension_numbers = #tpu.dot_dimension_numbers<[2], [2], [1], [1], [0, 0, 0, 1, 1, 1], [0], [0]>} : vector<2x8x16xbf16>, vector<2x8x16xbf16>, vector<2x8x8xf32> -> vector<2x8x8xf32>
    "tpu.trace_stop"() : () -> ()
    %cst_29 = arith.constant 2.500000e-01 : f32
    %105 = vector.broadcast %cst_29 : f32 to vector<2x8x8xf32>
    %106 = arith.mulf %104, %105 : vector<2x8x8xf32>
    %cst_30 = arith.constant -1.000000e+06 : f32
    %107 = vector.broadcast %cst_30 : f32 to vector<2x8x8xf32>
    %108 = arith.select %9, %106, %107 : vector<2x8x8xi1>, vector<2x8x8xf32>
    %cst_31 = arith.constant dense<0xFF800000> : vector<2x8xf32>
    %109 = vector.multi_reduction <maximumf>, %108, %cst_31 [2] : vector<2x8x8xf32> to vector<2x8xf32>
    %110 = vector.shape_cast %109 : vector<2x8xf32> to vector<2x8x1xf32>
    %111 = vector.broadcast %110 : vector<2x8x1xf32> to vector<2x8x8xf32>
    %112 = arith.subf %108, %111 : vector<2x8x8xf32>
    %113 = math.exp %112 : vector<2x8x8xf32>
    %cst_32 = arith.constant dense<0.000000e+00> : vector<2x8xf32>
    %114 = vector.multi_reduction <add>, %113, %cst_32 [2] : vector<2x8x8xf32> to vector<2x8xf32>
    %115 = vector.shape_cast %114 : vector<2x8xf32> to vector<2x8x1xf32>
    %116 = tpu.reciprocal %115 {approx = true} : vector<2x8x1xf32> -> vector<2x8x1xf32>
    %117 = vector.broadcast %116 : vector<2x8x1xf32> to vector<2x8x8xf32>
    %118 = arith.mulf %113, %117 : vector<2x8x8xf32>
    %119 = arith.truncf %118 : vector<2x8x8xf32> to vector<2x8x8xbf16>
    "tpu.trace_start"() <{level = 10 : i32, message = "bqk,bkd->bqd"}> : () -> ()
    %cst_33 = arith.constant dense<0.000000e+00> : vector<2x8x16xf32>
    %120 = tpu.matmul %119, %103, %cst_33 {dimension_numbers = #tpu.dot_dimension_numbers<[2], [1], [1], [2], [0, 0, 0, 1, 1, 2], [0], [0]>} : vector<2x8x8xbf16>, vector<2x8x16xbf16>, vector<2x8x16xf32> -> vector<2x8x16xf32>
    "tpu.trace_stop"() : () -> ()
    %121 = tpu.concatenate %97, %120 in 2 : vector<2x8x16xf32>, vector<2x8x16xf32> -> vector<2x8x32xf32>
    %122 = vector.shape_cast %121 : vector<2x8x32xf32> to vector<16x32xf32>
    %123 = arith.truncf %122 : vector<16x32xf32> to vector<16x32xbf16>
    %c1 = arith.constant 1 : index
    %c0_34 = arith.constant 0 : index
    %c0_35 = arith.constant 0 : index
    %124 = vector.load %arg4[%c1, %c0_34, %c0_35] : memref<2x32x32xbf16, #tpu.memory_space<vmem>>, vector<1x32x32xbf16>
    %125 = vector.shape_cast %124 : vector<1x32x32xbf16> to vector<32x32xbf16>
    %cst_36 = arith.constant dense<0.000000e+00> : vector<16x32xf32>
    %126 = tpu.matmul %123, %125, %cst_36 {dimension_numbers = #tpu.dot_dimension_numbers<[1], [0], [0], [1], [0, 0, 1, 1], [], []>} : vector<16x32xbf16>, vector<32x32xbf16>, vector<16x32xf32> -> vector<16x32xf32>
    %127 = vector.shape_cast %126 : vector<16x32xf32> to vector<2x8x32xf32>
    %c0_37 = arith.constant 0 : index
    %c0_38 = arith.constant 0 : index
    %c0_39 = arith.constant 0 : index
    %128 = vector.load %arg5[%c0_37, %c0_38, %c0_39] : memref<4x8x32xf32, #tpu.memory_space<vmem>>, vector<1x8x32xf32>
    %129 = vector.shape_cast %128 : vector<1x8x32xf32> to vector<8x32xf32>
    %130 = vector.shape_cast %129 : vector<8x32xf32> to vector<1x8x32xf32>
    %131 = vector.broadcast %130 : vector<1x8x32xf32> to vector<2x8x32xf32>
    %132 = arith.mulf %68, %131 : vector<2x8x32xf32>
    %c0_40 = arith.constant 0 : index
    %c0_41 = arith.constant 0 : index
    %c0_42 = arith.constant 0 : index
    %133 = vector.load %arg6[%c0_40, %c0_41, %c0_42] : memref<4x8x32xf32, #tpu.memory_space<vmem>>, vector<1x8x32xf32>
    %134 = vector.shape_cast %133 : vector<1x8x32xf32> to vector<8x32xf32>
    %135 = vector.shape_cast %134 : vector<8x32xf32> to vector<1x8x32xf32>
    %136 = vector.broadcast %135 : vector<1x8x32xf32> to vector<2x8x32xf32>
    %137 = arith.mulf %127, %136 : vector<2x8x32xf32>
    %138 = arith.addf %132, %137 : vector<2x8x32xf32>
    %cst_43 = arith.constant dense<0.000000e+00> : vector<2x8xf32>
    %139 = vector.multi_reduction <add>, %138, %cst_43 [2] : vector<2x8x32xf32> to vector<2x8xf32>
    %140 = vector.shape_cast %139 : vector<2x8xf32> to vector<2x8x1xf32>
    %cst_44 = arith.constant dense<0.000000e+00> : vector<2x1xf32>
    %141 = vector.multi_reduction <add>, %140, %cst_44 [1] : vector<2x8x1xf32> to vector<2x1xf32>
    %142 = vector.shape_cast %141 : vector<2x1xf32> to vector<2x1x1xf32>
    %c0_45 = arith.constant 0 : index
    %143 = memref.load %arg7[%c0_45] : memref<4xf32, #tpu.memory_space<smem>>
    %144 = vector.broadcast %143 : f32 to vector<2x1x1xf32>
    %145 = arith.addf %142, %144 : vector<2x1x1xf32>
    %c1_46 = arith.constant 1 : index
    %c0_47 = arith.constant 0 : index
    %c0_48 = arith.constant 0 : index
    %146 = vector.load %arg5[%c1_46, %c0_47, %c0_48] : memref<4x8x32xf32, #tpu.memory_space<vmem>>, vector<1x8x32xf32>
    %147 = vector.shape_cast %146 : vector<1x8x32xf32> to vector<8x32xf32>
    %148 = vector.shape_cast %147 : vector<8x32xf32> to vector<1x8x32xf32>
    %149 = vector.broadcast %148 : vector<1x8x32xf32> to vector<2x8x32xf32>
    %150 = arith.mulf %68, %149 : vector<2x8x32xf32>
    %c1_49 = arith.constant 1 : index
    %c0_50 = arith.constant 0 : index
    %c0_51 = arith.constant 0 : index
    %151 = vector.load %arg6[%c1_49, %c0_50, %c0_51] : memref<4x8x32xf32, #tpu.memory_space<vmem>>, vector<1x8x32xf32>
    %152 = vector.shape_cast %151 : vector<1x8x32xf32> to vector<8x32xf32>
    %153 = vector.shape_cast %152 : vector<8x32xf32> to vector<1x8x32xf32>
    %154 = vector.broadcast %153 : vector<1x8x32xf32> to vector<2x8x32xf32>
    %155 = arith.mulf %127, %154 : vector<2x8x32xf32>
    %156 = arith.addf %150, %155 : vector<2x8x32xf32>
    %cst_52 = arith.constant dense<0.000000e+00> : vector<2x8xf32>
    %157 = vector.multi_reduction <add>, %156, %cst_52 [2] : vector<2x8x32xf32> to vector<2x8xf32>
    %158 = vector.shape_cast %157 : vector<2x8xf32> to vector<2x8x1xf32>
    %cst_53 = arith.constant dense<0.000000e+00> : vector<2x1xf32>
    %159 = vector.multi_reduction <add>, %158, %cst_53 [1] : vector<2x8x1xf32> to vector<2x1xf32>
    %160 = vector.shape_cast %159 : vector<2x1xf32> to vector<2x1x1xf32>
    %c1_54 = arith.constant 1 : index
    %161 = memref.load %arg7[%c1_54] : memref<4xf32, #tpu.memory_space<smem>>
    %162 = vector.broadcast %161 : f32 to vector<2x1x1xf32>
    %163 = arith.addf %160, %162 : vector<2x1x1xf32>
    %c2 = arith.constant 2 : index
    %c0_55 = arith.constant 0 : index
    %c0_56 = arith.constant 0 : index
    %164 = vector.load %arg5[%c2, %c0_55, %c0_56] : memref<4x8x32xf32, #tpu.memory_space<vmem>>, vector<1x8x32xf32>
    %165 = vector.shape_cast %164 : vector<1x8x32xf32> to vector<8x32xf32>
    %166 = vector.shape_cast %165 : vector<8x32xf32> to vector<1x8x32xf32>
    %167 = vector.broadcast %166 : vector<1x8x32xf32> to vector<2x8x32xf32>
    %168 = arith.mulf %68, %167 : vector<2x8x32xf32>
    %c2_57 = arith.constant 2 : index
    %c0_58 = arith.constant 0 : index
    %c0_59 = arith.constant 0 : index
    %169 = vector.load %arg6[%c2_57, %c0_58, %c0_59] : memref<4x8x32xf32, #tpu.memory_space<vmem>>, vector<1x8x32xf32>
    %170 = vector.shape_cast %169 : vector<1x8x32xf32> to vector<8x32xf32>
    %171 = vector.shape_cast %170 : vector<8x32xf32> to vector<1x8x32xf32>
    %172 = vector.broadcast %171 : vector<1x8x32xf32> to vector<2x8x32xf32>
    %173 = arith.mulf %127, %172 : vector<2x8x32xf32>
    %174 = arith.addf %168, %173 : vector<2x8x32xf32>
    %cst_60 = arith.constant dense<0.000000e+00> : vector<2x8xf32>
    %175 = vector.multi_reduction <add>, %174, %cst_60 [2] : vector<2x8x32xf32> to vector<2x8xf32>
    %176 = vector.shape_cast %175 : vector<2x8xf32> to vector<2x8x1xf32>
    %cst_61 = arith.constant dense<0.000000e+00> : vector<2x1xf32>
    %177 = vector.multi_reduction <add>, %176, %cst_61 [1] : vector<2x8x1xf32> to vector<2x1xf32>
    %178 = vector.shape_cast %177 : vector<2x1xf32> to vector<2x1x1xf32>
    %c2_62 = arith.constant 2 : index
    %179 = memref.load %arg7[%c2_62] : memref<4xf32, #tpu.memory_space<smem>>
    %180 = vector.broadcast %179 : f32 to vector<2x1x1xf32>
    %181 = arith.addf %178, %180 : vector<2x1x1xf32>
    %c3 = arith.constant 3 : index
    %c0_63 = arith.constant 0 : index
    %c0_64 = arith.constant 0 : index
    %182 = vector.load %arg5[%c3, %c0_63, %c0_64] : memref<4x8x32xf32, #tpu.memory_space<vmem>>, vector<1x8x32xf32>
    %183 = vector.shape_cast %182 : vector<1x8x32xf32> to vector<8x32xf32>
    %184 = vector.shape_cast %183 : vector<8x32xf32> to vector<1x8x32xf32>
    %185 = vector.broadcast %184 : vector<1x8x32xf32> to vector<2x8x32xf32>
    %186 = arith.mulf %68, %185 : vector<2x8x32xf32>
    %c3_65 = arith.constant 3 : index
    %c0_66 = arith.constant 0 : index
    %c0_67 = arith.constant 0 : index
    %187 = vector.load %arg6[%c3_65, %c0_66, %c0_67] : memref<4x8x32xf32, #tpu.memory_space<vmem>>, vector<1x8x32xf32>
    %188 = vector.shape_cast %187 : vector<1x8x32xf32> to vector<8x32xf32>
    %189 = vector.shape_cast %188 : vector<8x32xf32> to vector<1x8x32xf32>
    %190 = vector.broadcast %189 : vector<1x8x32xf32> to vector<2x8x32xf32>
    %191 = arith.mulf %127, %190 : vector<2x8x32xf32>
    %192 = arith.addf %186, %191 : vector<2x8x32xf32>
    %cst_68 = arith.constant dense<0.000000e+00> : vector<2x8xf32>
    %193 = vector.multi_reduction <add>, %192, %cst_68 [2] : vector<2x8x32xf32> to vector<2x8xf32>
    %194 = vector.shape_cast %193 : vector<2x8xf32> to vector<2x8x1xf32>
    %cst_69 = arith.constant dense<0.000000e+00> : vector<2x1xf32>
    %195 = vector.multi_reduction <add>, %194, %cst_69 [1] : vector<2x8x1xf32> to vector<2x1xf32>
    %196 = vector.shape_cast %195 : vector<2x1xf32> to vector<2x1x1xf32>
    %c3_70 = arith.constant 3 : index
    %197 = memref.load %arg7[%c3_70] : memref<4xf32, #tpu.memory_space<smem>>
    %198 = vector.broadcast %197 : f32 to vector<2x1x1xf32>
    %199 = arith.addf %196, %198 : vector<2x1x1xf32>
    %200 = arith.maximumf %145, %163 : vector<2x1x1xf32>
    %201 = arith.subf %145, %200 : vector<2x1x1xf32>
    %202 = math.exp %201 : vector<2x1x1xf32>
    %203 = arith.subf %163, %200 : vector<2x1x1xf32>
    %204 = math.exp %203 : vector<2x1x1xf32>
    %205 = arith.addf %202, %204 : vector<2x1x1xf32>
    %206 = tpu.reciprocal %205 {approx = true} : vector<2x1x1xf32> -> vector<2x1x1xf32>
    %207 = arith.mulf %202, %206 : vector<2x1x1xf32>
    %208 = arith.mulf %204, %206 : vector<2x1x1xf32>
    %209 = arith.maximumf %181, %199 : vector<2x1x1xf32>
    %210 = arith.subf %181, %209 : vector<2x1x1xf32>
    %211 = math.exp %210 : vector<2x1x1xf32>
    %212 = arith.subf %199, %209 : vector<2x1x1xf32>
    %213 = math.exp %212 : vector<2x1x1xf32>
    %214 = arith.addf %211, %213 : vector<2x1x1xf32>
    %215 = tpu.reciprocal %214 {approx = true} : vector<2x1x1xf32> -> vector<2x1x1xf32>
    %216 = arith.mulf %211, %215 : vector<2x1x1xf32>
    %217 = arith.mulf %213, %215 : vector<2x1x1xf32>
    %218 = vector.broadcast %207 : vector<2x1x1xf32> to vector<2x8x32xf32>
    %219 = arith.mulf %218, %68 : vector<2x8x32xf32>
    %220 = vector.broadcast %208 : vector<2x1x1xf32> to vector<2x8x32xf32>
    %221 = arith.mulf %220, %127 : vector<2x8x32xf32>
    %222 = arith.addf %219, %221 : vector<2x8x32xf32>
    %223 = vector.broadcast %216 : vector<2x1x1xf32> to vector<2x8x32xf32>
    %224 = arith.mulf %223, %68 : vector<2x8x32xf32>
    %225 = vector.broadcast %217 : vector<2x1x1xf32> to vector<2x8x32xf32>
    %226 = arith.mulf %225, %127 : vector<2x8x32xf32>
    %227 = arith.addf %224, %226 : vector<2x8x32xf32>
    %228 = vector.shape_cast %222 : vector<2x8x32xf32> to vector<16x32xf32>
    %229 = arith.truncf %228 : vector<16x32xf32> to vector<16x32xbf16>
    %230 = vector.shape_cast %227 : vector<2x8x32xf32> to vector<16x32xf32>
    %231 = arith.truncf %230 : vector<16x32xf32> to vector<16x32xbf16>
    %c0_71 = arith.constant 0 : index
    %c0_72 = arith.constant 0 : index
    %c0_73 = arith.constant 0 : index
    %232 = vector.load %arg8[%c0_71, %c0_72, %c0_73] : memref<2x32x128xbf16, #tpu.memory_space<vmem>>, vector<1x32x128xbf16>
    %233 = vector.shape_cast %232 : vector<1x32x128xbf16> to vector<32x128xbf16>
    %cst_74 = arith.constant dense<0.000000e+00> : vector<16x128xf32>
    %234 = tpu.matmul %229, %233, %cst_74 {dimension_numbers = #tpu.dot_dimension_numbers<[1], [0], [0], [1], [0, 0, 1, 1], [], []>} : vector<16x32xbf16>, vector<32x128xbf16>, vector<16x128xf32> -> vector<16x128xf32>
    %c1_75 = arith.constant 1 : index
    %c0_76 = arith.constant 0 : index
    %c0_77 = arith.constant 0 : index
    %235 = vector.load %arg8[%c1_75, %c0_76, %c0_77] : memref<2x32x128xbf16, #tpu.memory_space<vmem>>, vector<1x32x128xbf16>
    %236 = vector.shape_cast %235 : vector<1x32x128xbf16> to vector<32x128xbf16>
    %cst_78 = arith.constant dense<0.000000e+00> : vector<16x128xf32>
    %237 = tpu.matmul %231, %236, %cst_78 {dimension_numbers = #tpu.dot_dimension_numbers<[1], [0], [0], [1], [0, 0, 1, 1], [], []>} : vector<16x32xbf16>, vector<32x128xbf16>, vector<16x128xf32> -> vector<16x128xf32>
    %238 = arith.addf %234, %237 : vector<16x128xf32>
    %c0_79 = arith.constant 0 : index
    %c0_80 = arith.constant 0 : index
    %239 = vector.load %arg9[%c0_79, %c0_80] : memref<1x128xf32, #tpu.memory_space<vmem>>, vector<1x128xf32>
    %240 = vector.broadcast %239 : vector<1x128xf32> to vector<16x128xf32>
    %241 = arith.addf %238, %240 : vector<16x128xf32>
    %242 = vector.shape_cast %241 : vector<16x128xf32> to vector<2x8x128xf32>
    %c0_81 = arith.constant 0 : index
    %c0_82 = arith.constant 0 : index
    %c0_83 = arith.constant 0 : index
    %243 = vector.load %arg10[%c0_81, %c0_82, %c0_83] : memref<2x8x128xf32, #tpu.memory_space<vmem>>, vector<2x8x128xf32>
    tpu.vector_store %arg10[%c0_81, %c0_82, %c0_83], %242 {strides = array<i32>} : memref<2x8x128xf32, #tpu.memory_space<vmem>>, vector<2x8x128xf32>,
    return
  }
  func.func @transform_0(%arg0: i32) -> (i32, i32) {
    %c0_i32 = arith.constant 0 : i32
    %c0_i32_0 = arith.constant 0 : i32
    return %arg0, %c0_i32 : i32, i32
  }
  func.func @transform_1(%arg0: i32) -> (i32, i32, i32) {
    %c0_i32 = arith.constant 0 : i32
    %c0_i32_0 = arith.constant 0 : i32
    %c0_i32_1 = arith.constant 0 : i32
    return %arg0, %c0_i32, %c0_i32_0 : i32, i32, i32
  }
  func.func @transform_2(%arg0: i32) -> (i32, i32) {
    %c0_i32 = arith.constant 0 : i32
    %c0_i32_0 = arith.constant 0 : i32
    %c0_i32_1 = arith.constant 0 : i32
    return %c0_i32, %c0_i32_0 : i32, i32
  }
  func.func @transform_3(%arg0: i32) -> (i32, i32, i32) {
    %c0_i32 = arith.constant 0 : i32
    %c0_i32_0 = arith.constant 0 : i32
    %c0_i32_1 = arith.constant 0 : i32
    %c0_i32_2 = arith.constant 0 : i32
    return %c0_i32, %c0_i32_0, %c0_i32_1 : i32, i32, i32
  }
  func.func @transform_4(%arg0: i32) -> (i32, i32, i32) {
    %c0_i32 = arith.constant 0 : i32
    %c0_i32_0 = arith.constant 0 : i32
    %c0_i32_1 = arith.constant 0 : i32
    %c0_i32_2 = arith.constant 0 : i32
    return %c0_i32, %c0_i32_0, %c0_i32_1 : i32, i32, i32
  }
  func.func @transform_5(%arg0: i32) -> (i32, i32, i32) {
    %c0_i32 = arith.constant 0 : i32
    %c0_i32_0 = arith.constant 0 : i32
    %c0_i32_1 = arith.constant 0 : i32
    %c0_i32_2 = arith.constant 0 : i32
    return %c0_i32, %c0_i32_0, %c0_i32_1 : i32, i32, i32
  }
  func.func @transform_6(%arg0: i32) -> i32 {
    %c0_i32 = arith.constant 0 : i32
    %c0_i32_0 = arith.constant 0 : i32
    return %c0_i32 : i32
  }
  func.func @transform_7(%arg0: i32) -> (i32, i32, i32) {
    %c0_i32 = arith.constant 0 : i32
    %c0_i32_0 = arith.constant 0 : i32
    %c0_i32_1 = arith.constant 0 : i32
    %c0_i32_2 = arith.constant 0 : i32
    return %c0_i32, %c0_i32_0, %c0_i32_1 : i32, i32, i32
  }
  func.func @transform_8(%arg0: i32) -> (i32, i32) {
    %c0_i32 = arith.constant 0 : i32
    %c0_i32_0 = arith.constant 0 : i32
    %c0_i32_1 = arith.constant 0 : i32
    return %c0_i32, %c0_i32_0 : i32, i32
  }
  func.func @transform_9(%arg0: i32) -> (i32, i32, i32) {
    %c0_i32 = arith.constant 0 : i32
    %c0_i32_0 = arith.constant 0 : i32
    %c0_i32_1 = arith.constant 0 : i32
    return %arg0, %c0_i32, %c0_i32_0 : i32, i32, i32
  }
}

</mosaic_0001>

<bundles_post_ra>
// kernel: tpu_custom_call.1
= control target key start
LH: loop header
LB: loop body
LE: loop exit
PB: predicated region body
PF: predicated region fallthrough
CT: control target
= control target key end

     0   :  { %14 = vsyncpa [#allocation3], 0  ;;  %s2594_s0 = inlined_call_operand.vmem [shape: s32[2,1], index: 0, kind: input, shape index: {}]   ;;  %s2595_s1 = inlined_call_operand.hbm [shape: f32[2,8,32], index: 1, kind: input, shape index: {}]   ;;  %s2596_s2 = inlined_call_operand.hbm [shape: bf16[32,192], index: 2, kind: input, shape index: {}]   ;;  %s2597_s3 = inlined_call_operand.hbm [shape: bf16[2,32,32], index: 3, kind: input, shape index: {}]   ;;  %s2598_s4 = inlined_call_operand.hbm [shape: f32[4,8,32], index: 4, kind: input, shape index: {}]   ;;  %s2599_s5 = inlined_call_operand.hbm [shape: f32[4,8,32], index: 5, kind: input, shape index: {}]   ;;  %s2600_s6 = inlined_call_operand.vmem [shape: f32[4], index: 6, kind: input, shape index: {}]   ;;  %s2601_s7 = inlined_call_operand.hbm [shape: bf16[2,32,128], index: 7, kind: input, shape index: {}]   ;;  %s2602_s8 = inlined_call_operand.vmem [shape: f32[1,128], index: 8, kind: input, shape index: {}]   ;;  %s2603_s9 = inlined_call_operand.hbm [shape: f32[2,8,128], index: 9, kind: output, shape index: {}]  }
   0x1   :  { %15 = vsyncpa [#allocation7], 0 }
   0x2   :  { %16 = vsyncpa [#allocation10], 0 }
   0x3   :  { %17 = vsyncpa [#allocation5], 0 }
   0x4   :  { %18 = vsyncpa [#allocation14], 0 }
   0x5   :  { %19 = vsyncpa [#allocation4], 0  ;;  %s2115_s30 = smov [#allocation6]   ;;  %s2116_s11 = smov [#allocation9]  }
   0x6   :  { %s39_s10 = sshll.u32 %s2115_s30, 4  ;;  %s63_s12 = sshll.u32 %s2116_s11, 4  ;;  %s40_s10 = int_to_ptr.vmem [resolvable:$true] %s39_s10  ;;  %s2187_s12 = int_to_ptr.vmem [resolvable:$true] %s63_s12 }
   0x7   :  { %s1937_s15 = scalar_lea.hbm %s2596_s2, 512 }
   0x8   :  { %p1938_p0 = scmp.ne.s32.totalorder %s2596_s2, %s1937_s15  ;;  %p1941_p1 = scmp.lt.u32.totalorder %s1937_s15, %s2596_s2 }
   0xa   :  { %p1943_p2 = pnand %p1941_p1, %p1938_p0 }
   0xc   :  { %1946 = shalt.err (!%p1943_p2)
}
   0xd   :  { %s1947_s20 = scalar_lea.vmem %s40_s10, 512  ;;  %p1952_p4 = scmp.lt.s32.totalorder %s40_s10, %s40_s10 }
   0xe   :  { %p1948_p3 = scmp.ne.s32.totalorder %s40_s10, %s1947_s20  ;;  %p1953_p5 = scmp.lt.s32.totalorder %s1947_s20, %s1947_s20 }
  0x10   :  { %p1954_p6 = por %p1953_p5, %p1952_p4 }
  0x12   :  { %p1955_p7 = pnand %p1954_p6, %p1948_p3 }
  0x14   :  { %1958 = shalt.err (!%p1955_p7)
}
  0x15   :  { %s2117_s21 = smov 128   ;;  %s2118_s22 = smov 8  }
  0x16   :  { %45 = dma.hbm_to_vmem [thread:$0]  %s2596_s2, 512, %s40_s10, [#allocation7], %s2117_s21, %s2117_s21, %s2118_s22  }
  0x17   :  { %s1959_s27 = scalar_lea.hbm %s2598_s4, 512 }
  0x18   :  { %p1960_p8 = scmp.ne.s32.totalorder %s2598_s4, %s1959_s27  ;;  %p1963_p9 = scmp.lt.u32.totalorder %s1959_s27, %s2598_s4 }
  0x1a   :  { %p1965_p10 = pnand %p1963_p9, %p1960_p8 }
  0x1c   :  { %1968 = shalt.err (!%p1965_p10)
}
  0x1d   :  { %s1969_s13 = scalar_lea.vmem %s2187_s12, 512  ;;  %p1974_p12 = scmp.lt.s32.totalorder %s2187_s12, %s2187_s12 }
  0x1e   :  { %p1970_p11 = scmp.ne.s32.totalorder %s2187_s12, %s1969_s13  ;;  %p1975_p13 = scmp.lt.s32.totalorder %s1969_s13, %s1969_s13 }
  0x20   :  { %p1976_p0 = por %p1975_p13, %p1974_p12 }
  0x22   :  { %p1977_p1 = pnand %p1976_p0, %p1970_p11 }
  0x24   :  { %1980 = shalt.err (!%p1977_p1)
}
  0x25   :  { %69 = dma.hbm_to_vmem [thread:$0]  %s2598_s4, 512, %s2187_s12, [#allocation10], %s2117_s21, %s2117_s21, %s2118_s22  }
  0x26   :  { %s2119_s14 = smov [#allocation2]   ;;  %s2120_s16 = smov [#allocation8]  }
  0x27   :  { %s27_s15 = sshll.u32 %s2119_s14, 4  ;;  %s51_s17 = sshll.u32 %s2120_s16, 4  ;;  %s28_s15 = int_to_ptr.vmem [resolvable:$true] %s27_s15  ;;  %s2224_s17 = int_to_ptr.vmem [resolvable:$true] %s51_s17 }
  0x28   :  { %s1981_s20 = scalar_lea.hbm %s2595_s1, 256 }
  0x29   :  { %p1982_p2 = scmp.ne.s32.totalorder %s2595_s1, %s1981_s20  ;;  %p1985_p3 = scmp.lt.u32.totalorder %s1981_s20, %s2595_s1 }
  0x2b   :  { %p1987_p4 = pnand %p1985_p3, %p1982_p2 }
  0x2d   :  { %1990 = shalt.err (!%p1987_p4)
}
  0x2e   :  { %s1991_s4 = scalar_lea.vmem %s28_s15, 256  ;;  %p1996_p6 = scmp.lt.s32.totalorder %s28_s15, %s28_s15 }
  0x2f   :  { %p1992_p5 = scmp.ne.s32.totalorder %s28_s15, %s1991_s4  ;;  %p1997_p7 = scmp.lt.s32.totalorder %s1991_s4, %s1991_s4 }
  0x31   :  { %p1998_p8 = por %p1997_p7, %p1996_p6 }
  0x33   :  { %p1999_p9 = pnand %p1998_p8, %p1992_p5 }
  0x35   :  { %2002 = shalt.err (!%p1999_p9)
}
  0x36   :  { %33 = dma.hbm_to_vmem [thread:$0]  %s2595_s1, 256, %s28_s15, [#allocation3], %s2117_s21, %s2117_s21, %s2118_s22  }
  0x37   :  { %s2003_s30 = scalar_lea.hbm %s2597_s3, 512 }
  0x38   :  { %p2004_p10 = scmp.ne.s32.totalorder %s2597_s3, %s2003_s30  ;;  %p2007_p11 = scmp.lt.u32.totalorder %s2003_s30, %s2597_s3 }
  0x3a   :  { %p2009_p12 = pnand %p2007_p11, %p2004_p10 }
  0x3c   :  { %2012 = shalt.err (!%p2009_p12)
}
  0x3d   :  { %s2013_s14 = scalar_lea.vmem %s2224_s17, 512  ;;  %p2018_p0 = scmp.lt.s32.totalorder %s2224_s17, %s2224_s17 }
  0x3e   :  { %p2014_p13 = scmp.ne.s32.totalorder %s2224_s17, %s2013_s14  ;;  %p2019_p1 = scmp.lt.s32.totalorder %s2013_s14, %s2013_s14 }
  0x40   :  { %p2020_p2 = por %p2019_p1, %p2018_p0 }
  0x42   :  { %p2021_p3 = pnand %p2020_p2, %p2014_p13 }
  0x44   :  { %2024 = shalt.err (!%p2021_p3)
}
  0x45   :  { %s2121_s1 = smov 64   ;;  %s2122_s15 = smov 4  }
  0x46   :  { %57 = dma.hbm_to_vmem [thread:$0]  %s2597_s3, 512, %s2224_s17, [#allocation7], %s2121_s1, %s2121_s1, %s2122_s15  }
  0x47   :  { %s88_s23 = sshll.u32 %s2600_s6, 4  ;;  %s2123_s24 = smov [#allocation11]   ;;  %s89_s23 = int_to_ptr.vmem [resolvable:$true] %s88_s23 }
  0x48   :  { %s75_s25 = sshll.u32 %s2123_s24, 4  ;;  %s2025_s12 = scalar_lea.hbm %s2599_s5, 512  ;;  %s76_s25 = int_to_ptr.vmem [resolvable:$true] %s75_s25 }
  0x49   :  { %p2026_p4 = scmp.ne.s32.totalorder %s2599_s5, %s2025_s12  ;;  %p2029_p5 = scmp.lt.u32.totalorder %s2025_s12, %s2599_s5 }
  0x4b   :  { %p2031_p6 = pnand %p2029_p5, %p2026_p4 }
  0x4d   :  { %2034 = shalt.err (!%p2031_p6)
}
  0x4e   :  { %s2035_s3 = scalar_lea.vmem %s76_s25, 512  ;;  %p2040_p8 = scmp.lt.s32.totalorder %s76_s25, %s76_s25 }
  0x4f   :  { %p2036_p7 = scmp.ne.s32.totalorder %s76_s25, %s2035_s3  ;;  %p2041_p9 = scmp.lt.s32.totalorder %s2035_s3, %s2035_s3 }
  0x51   :  { %p2042_p10 = por %p2041_p9, %p2040_p8 }
  0x53   :  { %p2043_p11 = pnand %p2042_p10, %p2036_p7 }
  0x55   :  { %2046 = shalt.err (!%p2043_p11)
}
  0x56   :  { %81 = dma.hbm_to_vmem [thread:$0]  %s2599_s5, 512, %s76_s25, [#allocation10], %s2117_s21, %s2117_s21, %s2118_s22  }
  0x57   :  { %s2047_s11 = scalar_lea.vmem %s89_s23, 16  ;;  %p2052_p13 = scmp.lt.s32.totalorder %s89_s23, %s89_s23 }
  0x58   :  { %p2048_p12 = scmp.ne.s32.totalorder %s89_s23, %s2047_s11  ;;  %p2053_p0 = scmp.lt.s32.totalorder %s2047_s11, %s2047_s11 }
  0x5a   :  { %p2054_p1 = por %p2053_p0, %p2052_p13 }
  0x5c   :  { %p2055_p2 = pnand %p2054_p1, %p2048_p12 }
  0x5e   :  { %2058 = shalt.err (!%p2055_p2)
}
  0x5f   :  { %s2124_s13 = smov [#allocation12]   ;;  %s2125_s2 = smov [#allocation13]  }
  0x60   :  { %91 = dma.vmem_to_smem %s89_s23, 16, %s2124_s13, [#allocation5]  }
  0x61   :  { %s97_s10 = sshll.u32 %s2125_s2, 4  ;;  %s2059_s18 = scalar_lea.hbm %s2601_s7, 512  ;;  %s98_s10 = int_to_ptr.vmem [resolvable:$true] %s97_s10 }
  0x62   :  { %p2060_p3 = scmp.ne.s32.totalorder %s2601_s7, %s2059_s18  ;;  %p2063_p4 = scmp.lt.u32.totalorder %s2059_s18, %s2601_s7 }
  0x64   :  { %p2065_p5 = pnand %p2063_p4, %p2060_p3 }
  0x66   :  { %2068 = shalt.err (!%p2065_p5)
}
  0x67   :  { %s2069_s25 = scalar_lea.vmem %s98_s10, 512  ;;  %p2074_p7 = scmp.lt.s32.totalorder %s98_s10, %s98_s10 }
  0x68   :  { %p2070_p6 = scmp.ne.s32.totalorder %s98_s10, %s2069_s25  ;;  %p2075_p8 = scmp.lt.s32.totalorder %s2069_s25, %s2069_s25 }
  0x6a   :  { %p2076_p9 = por %p2075_p8, %p2074_p7 }
  0x6c   :  { %p2077_p10 = pnand %p2076_p9, %p2070_p6 }
  0x6e   :  { %2080 = shalt.err (!%p2077_p10)
}
  0x6f   :  { %103 = dma.hbm_to_vmem [thread:$0]  %s2601_s7, 512, %s98_s10, [#allocation14], %s2121_s1, %s2121_s1, %s2122_s15  }
  0x70   :  { %2103 = dma.done.wait [#allocation3], 256  }
  0x71   :  { %2104 = vsyncadd [#allocation3], 4294967040 }
  0x72   :  { %2105 = dma.done.wait [#allocation7], 1024  }
  0x73   :  { %2106 = vsyncadd [#allocation7], 4294966272 }
  0x74   :  { %2107 = dma.done.wait [#allocation10], 1024  }
  0x75   :  { %2108 = vsyncadd [#allocation10], 4294966272 }
  0x76   :  { %2109 = dma.done.wait [#allocation5], 16  }
  0x77   :  { %2110 = vsyncadd [#allocation5], 4294967280 }
  0x78   :  { %2111 = dma.done.wait [#allocation14], 512  }
  0x79   :  { %2112 = vsyncadd [#allocation14], 4294966784 }
  0x7a   :  { %127 = sfence }
  0x7b   :  { %v1867_v0 = vld [vmem:[#allocation6 + $0x4] ss:$8 sps:$4 sm:$0xff]   ;;  %v1869_v1 = vld [vmem:[#allocation6] ss:$8 sps:$4 sm:$0xff]   ;;  %v2126_v2 = vmov 0   ;;  %v129_v5 = vld [vmem:[#allocation2] sm:$0xff]  ;;  %v215_v13 = vlaneseq }
  0x7c   :  { %192 = vmatprep.mubr.bf16.mxu0 %v2126_v2  ;;  %1855 = vset.pattern.permute.xlu1 %v2126_v2  ;;  %v1870_v3 = vld [vmem:[#allocation6 + $0x14] ss:$8 sps:$4 sm:$0xff]   ;;  %v1872_v4 = vld [vmem:[#allocation6 + $0x10] ss:$8 sps:$4 sm:$0xff]   ;;  %vm156_vm0 = vcmask 261120   ;;  %v2127_v8 = vmov 0.0  }
  0x7d   :  { %160 = vmatprep.subr.bf16.mxu0 %v1867_v0  ;;  %1866 = vset.pattern.permute.xlu0 %v2126_v2  ;;  %v130_v6 = vld [vmem:[#allocation2 + $0x8] sm:$0xff]  ;;  %vm2128_vm1 = vmmov 0   ;;  %s2129_s7 = smov 96   ;;  %v2130_v15 = vmov 1966171168   ;;  %v216_v17 = vshrl.u32 %v215_v13, 7 }
  0x7e   :  { %161 = vmatpush1.bf16.msra.mxu0 %v1869_v1  ;;  %v131_v7 = vpack.c.bf16 %v130_v6, %v129_v5  ;;  %1705 = vmatprep.subr.bf16.mxu1 %v2127_v8  ;;  %v213_v16 = vunpack.c.l.s4 %v2130_v15  ;;  %v1628_v19 = vld.sshfl [vmem:[%s2594_s0] sm:$0x11 pattern:$0x75316420]  ;;  %vm249_vm2 = vcmask 130048   ;;  %v2328_v32 = vand.u32 127, %v215_v13 }
  0x7f   :  { %162 = vmatprep.subr.bf16.mxu0 %v1870_v3  ;;  %1707 = vmatprep.mubr.msk.bf16.mxu1 %vm2128_vm1, %v2127_v8  ;;  %v211_v20 = vcombine.high %v1628_v19, %v1628_v19  ;;  %v230_v23 = vsub.s32 0, %v216_v17  ;;  %vm349_vm4 = vcmask 64512   ;;  %s2131_s0 = smov 80   ;;  %s2132_s12 = smov 112   ;;  %vm379_vm6 = vcmask 1043456  }
  0x80   :  { %v214_v21 = vunpack.c.0.s8 %v213_v16  ;;  %s2134_s27 = smov 32   ;;  %s2135_s28 = smov 16  }
  0x81   :  { %s2554_s29 = sld [smem:[#allocation12]]  ;;  %s2556_s30 = sld [smem:[#allocation12 + $0x1]] }
  0x82   :  { %163 = vmatpush1.bf16.msra.mxu0 %v1872_v4  ;;  %v217_v22 = vsub.s32 %v214_v21, %v216_v17  ;;  %s2558_s3 = sld [smem:[#allocation12 + $0x2]]  ;;  %s2560_s6 = sld [smem:[#allocation12 + $0x3]] }
  0x83   :  { %1711 = vmatprep.subr.bf16.mxu0 %v2127_v8  ;;  %s2136_s13 = smov [#allocation15]  }
  0x84   :  { %v218_v24 = vrot.slane %v1628_v19, %v217_v22  ;;  %v225_v25 = vrot.slane %v211_v20, %v217_v22  ;;  %s1607_s2 = sshll.u32 %s2136_s13, 4  ;;  %s1608_s2 = int_to_ptr.vmem [resolvable:$true] %s1607_s2 }
  0x85   :  { %1627 = vmatmul.mubr.msk.bf16.vlgmr.msra.gmra.mrb[0].mxu0 %vm156_vm0, %v131_v7  ;;  %s2081_s10 = scalar_lea.vmem %s1608_s2, 256  ;;  %p2086_p12 = scmp.lt.s32.totalorder %s1608_s2, %s1608_s2 }
  0x86   :  { %1713 = vmatprep.mubr.msk.bf16.mxu0 %vm2128_vm1, %v2127_v8  ;;  %v231_v26 = vrot.slane %v218_v24, %v230_v23  ;;  %v235_v27 = vrot.slane %v225_v25, %v230_v23  ;;  %p2082_p11 = scmp.ne.s32.totalorder %s1608_s2, %s2081_s10  ;;  %p2087_p13 = scmp.lt.s32.totalorder %s2081_s10, %s2081_s10 }
  0x88   :  { %237 = vperm.xlu1 %1855, %v231_v26   ;;  %p2088_p0 = por %p2087_p13, %p2086_p12 }
  0x8a   :  { %p2089_p1 = pnand %p2088_p0, %p2082_p11 }
  0x8c   :  { %240 = vperm.xlu1 %1855, %v235_v27  }
 0x107   :  { %v2330_v33 = vpop.permute.xlu1 %237 }
 0x108   :  { %vm242_vm3 = vcmp.lt.s32.totalorder %v2328_v32, %v2330_v33 }
 0x10b   :  { %v2334_v38 = vpop.permute.xlu1 %240 }
 0x10c   :  { %vm243_vm5 = vcmp.lt.s32.totalorder %v2328_v32, %v2334_v38 }
 0x158   :  { %v194_v9 = vpop.f32.mrb[0].mxu0 }
 0x159   :  { %v2301_v10 = vpack.c.bf16 %v194_v9, %v194_v9  ;;  %v2303_v11 = vpop.f32.mrb[1].mxu0 }
 0x15a   :  { %v198_v12 = vpop.f32.mrb[2].mxu0 }
 0x15b   :  { %247 = vrot.lane.b32.xlu0 %v2301_v10, %s2129_s7  ;;  %v2307_v14 = vpop.f32.mrb[3].mxu0  ;;  %v2309_v18 = vpack.c.bf16 %v198_v12, %v198_v12 }
 0x15f   :  { %297 = vrot.lane.b32.xlu0 %v2309_v18, %s2129_s7 }
 0x1cd   :  { %v248_v28 = vpop.permute.xlu0 %247 }
 0x1ce   :  { %v254_v29 = vsel %vm249_vm2, %v248_v28, 0 }
 0x1cf   :  { %1706 = vmatpush3.bf16.xpose.msra.mxu1 %v254_v29 }
 0x1d0   :  { %1717 = vmatprep.subr.bf16.mxu1 %v2127_v8 }
 0x1d1   :  { %v298_v30 = vpop.permute.xlu0 %297 }
 0x1d2   :  { %v303_v31 = vsel %vm249_vm2, %v298_v30, 0 }
 0x1d3   :  { %1712 = vmatpush3.bf16.xpose.msra.mxu0 %v303_v31 }
 0x1d4   :  { %1723 = vmatprep.subr.bf16.mxu0 %v2127_v8 }
 0x1d6   :  { %1708 = vmatmul.mubr.msk.bf16.vlgmr.msra.gmra.mrb[0].mxu1 %vm249_vm2, %v2301_v10 }
 0x1d7   :  { %1719 = vmatprep.mubr.msk.bf16.mxu1 %vm2128_vm1, %v2127_v8 }
 0x1da   :  { %1714 = vmatmul.mubr.msk.bf16.vlgmr.msra.gmra.mrb[4].mxu0 %vm249_vm2, %v2309_v18 }
 0x1db   :  { %1725 = vmatprep.mubr.msk.bf16.mxu0 %vm2128_vm1, %v2127_v8 }
 0x2a9   :  { %v290_v34 = vpop.f32.mrb[0].mxu1 }
 0x2aa   :  { %v345_v35 = vmul.f32 0.25, %v290_v34  ;;  %v1709_v36 = vpop.f32.mrb[1].mxu1 }
 0x2ab   :  { %v293_v37 = vpop.f32.mrb[2].mxu1 }
 0x2ac   :  { %v1710_v39 = vpop.f32.mrb[3].mxu1  ;;  %v347_v40 = vsel %vm242_vm3, %v345_v35, -1000000.0 }
 0x2ad   :  { %v339_v41 = vpop.f32.mrb[4].mxu0  ;;  %v350_v42 = vsel %vm349_vm4, %v347_v40, -inf }
 0x2ae   :  { %v346_v43 = vmul.f32 0.25, %v339_v41  ;;  %351 = vmax.xlane.f32.xlu0 %v350_v42  ;;  %v1715_v44 = vpop.f32.mrb[5].mxu0 }
 0x2af   :  { %v342_v45 = vpop.f32.mrb[6].mxu0 }
 0x2b0   :  { %v1716_v46 = vpop.f32.mrb[7].mxu0  ;;  %v348_v47 = vsel %vm243_vm5, %v346_v43, -1000000.0 }
 0x2b1   :  { %v353_v48 = vsel %vm349_vm4, %v348_v47, -inf }
 0x2b2   :  { %354 = vmax.xlane.f32.xlu1 %v353_v48 }
 0x2c3   :  { %374 = vrot.lane.b32.xlu1 %v2301_v10, %s2121_s1 }
 0x2c7   :  { %473 = vrot.lane.b32.xlu1 %v2301_v10, %s2131_s0 }
 0x2cb   :  { %523 = vrot.lane.b32.xlu1 %v2309_v18, %s2131_s0 }
 0x2cf   :  { %521 = vrot.lane.b32.xlu1 %v2309_v18, %s2132_s12 }
 0x33b   :  { %v352_v49 = vpop.xlane.xlu0 %351 }
 0x33c   :  { %v356_v50 = vsub.f32 %v347_v40, %v352_v49 }
 0x33e   :  { %v358_v51 = vmul.f32 1.442695, %v356_v50 }
 0x33f   :  { %v355_v52 = vpop.xlane.xlu1 %354 }
 0x340   :  { %1881 = vpow2.f32 %v358_v51  ;;  %v357_v53 = vsub.f32 %v348_v47, %v355_v52 }
 0x342   :  { %v360_v54 = vmul.f32 1.442695, %v357_v53 }
 0x343   :  { %v375_v55 = vpop.permute.xlu1 %374 }
 0x344   :  { %1883 = vpow2.f32 %v360_v54  ;;  %v381_v56 = vsel %vm379_vm6, %v375_v55, 0 }
 0x345   :  { %1718 = vmatpush3.bf16.msra.mxu1 %v381_v56 }
 0x346   :  { %1729 = vmatprep.subr.bf16.mxu1 %v2127_v8 }
 0x347   :  { %v474_v2 = vpop.permute.xlu1 %473 }
 0x348   :  { %v479_v6 = vsel %vm249_vm2, %v474_v2, 0 }
 0x34a   :  { %v1882_v57 = vpop.eup %1881 }
 0x34b   :  { %v362_v58 = vsel %vm349_vm4, %v1882_v57, 0.0  ;;  %v524_v9 = vpop.permute.xlu1 %523 }
 0x34c   :  { %363 = vadd.xlane.f32.xlu0 %v362_v58  ;;  %v529_v13 = vsel %vm249_vm2, %v524_v9, 0 }
 0x34e   :  { %v1884_v59 = vpop.eup %1883 }
 0x34f   :  { %v365_v60 = vsel %vm349_vm4, %v1884_v59, 0.0  ;;  %v522_v16 = vpop.permute.xlu1 %521 }
 0x350   :  { %366 = vadd.xlane.f32.xlu0 %v365_v60 }
 0x366   :  { %423 = vrot.lane.b32.xlu0 %v2309_v18, %s2121_s1  ;;  %s2133_s1 = smov 48  }
 0x36a   :  { %471 = vrot.lane.b32.xlu0 %v2301_v10, %s2132_s12 }
 0x3d9   :  { %v364_v61 = vpop.xlane.xlu0 %363 }
 0x3da   :  { %1885 = vrcp.f32 %v364_v61 }
 0x3dd   :  { %v367_v62 = vpop.xlane.xlu0 %366 }
 0x3de   :  { %1887 = vrcp.f32 %v367_v62 }
 0x3e1   :  { %v424_v63 = vpop.permute.xlu0 %423 }
 0x3e2   :  { %v429_v0 = vsel %vm379_vm6, %v424_v63, 0  ;;  %v2404_v63 = vpack.c.bf16 %v2303_v11, %v2303_v11  ;;  %v1873_v11 = vld [vmem:[#allocation8] sm:$0xff]  }
 0x3e3   :  { %1724 = vmatpush3.bf16.msra.mxu0 %v429_v0 }
 0x3e4   :  { %v1886_v1 = vpop.eup %1885  ;;  %1735 = vmatprep.subr.bf16.mxu0 %v2127_v8  ;;  %v774_v2 = vsel %vm249_vm2, %v2404_v63, 0 }
 0x3e5   :  { %v370_v3 = vmul.f32 %v1886_v1, %v1882_v57  ;;  %v472_v15 = vpop.permute.xlu0 %471 }
 0x3e7   :  { %v372_v4 = vpack.c.bf16 %v370_v3, %v370_v3  ;;  %v1874_v3 = vld [vmem:[#allocation8 + $0x8] sm:$0xff]  }
 0x3e8   :  { %v1888_v5 = vpop.eup %1887 }
 0x3e9   :  { %v371_v7 = vmul.f32 %v1888_v5, %v1884_v59  ;;  %1720 = vmatmul.mubr.msk.bf16.vlgmr.msra.gmra.mrb[4].mxu1 %vm349_vm4, %v372_v4 }
 0x3ea   :  { %1730 = vmatpush3.bf16.xpose.msra.mxu1 %v479_v6  ;;  %1731 = vmatprep.mubr.msk.bf16.mxu1 %vm2128_vm1, %v2127_v8 }
 0x3eb   :  { %v373_v12 = vpack.c.bf16 %v371_v7, %v371_v7  ;;  %1741 = vmatprep.subr.bf16.mxu1 %v2127_v8 }
 0x3ed   :  { %1726 = vmatmul.mubr.msk.bf16.vlgmr.msra.gmra.mrb[8].mxu0 %vm349_vm4, %v373_v12 }
 0x3ee   :  { %1736 = vmatpush3.bf16.xpose.msra.mxu0 %v529_v13  ;;  %1737 = vmatprep.mubr.msk.bf16.mxu0 %vm2128_vm1, %v2127_v8 }
 0x3ef   :  { %1747 = vmatprep.subr.bf16.mxu0 %v2127_v8 }
 0x3f1   :  { %1732 = vmatmul.mubr.msk.bf16.vlgmr.msra.gmra.mrb[8].mxu1 %vm249_vm2, %v472_v15 }
 0x3f2   :  { %1743 = vmatprep.mubr.msk.bf16.mxu1 %vm2128_vm1, %v2127_v8 }
 0x3f5   :  { %1738 = vmatmul.mubr.msk.bf16.vlgmr.msra.gmra.mrb[12].mxu0 %vm249_vm2, %v522_v16 }
 0x3f6   :  { %1749 = vmatprep.mubr.msk.bf16.mxu0 %vm2128_vm1, %v2127_v8 }
 0x4bc   :  { %v2380_v17 = vpop.f32.mrb[4].mxu1 }
 0x4bd   :  { %v1721_v19 = vpop.f32.mrb[5].mxu1 }
 0x4be   :  { %v420_v20 = vpop.f32.mrb[6].mxu1 }
 0x4bf   :  { %v1722_v21 = vpop.f32.mrb[7].mxu1 }
 0x4c0   :  { %v2382_v22 = vpop.f32.mrb[8].mxu0 }
 0x4c1   :  { %v1727_v23 = vpop.f32.mrb[9].mxu0 }
 0x4c2   :  { %v468_v24 = vpop.f32.mrb[10].mxu0  ;;  %v2422_v23 = vpack.c.bf16 %v2307_v14, %v2307_v14 }
 0x4c3   :  { %v1728_v25 = vpop.f32.mrb[11].mxu0 }
 0x4c4   :  { %v515_v26 = vpop.f32.mrb[8].mxu1 }
 0x4c5   :  { %v571_v27 = vmul.f32 0.25, %v515_v26  ;;  %v1733_v28 = vpop.f32.mrb[9].mxu1 }
 0x4c6   :  { %v518_v29 = vpop.f32.mrb[10].mxu1  ;;  %v822_v28 = vsel %vm249_vm2, %v2422_v23, 0 }
 0x4c7   :  { %v1734_v30 = vpop.f32.mrb[11].mxu1  ;;  %v573_v31 = vsel %vm242_vm3, %v571_v27, -1000000.0 }
 0x4c8   :  { %v565_v34 = vpop.f32.mrb[12].mxu0  ;;  %v575_v35 = vsel %vm349_vm4, %v573_v31, -inf }
 0x4c9   :  { %v572_v36 = vmul.f32 0.25, %v565_v34  ;;  %576 = vmax.xlane.f32.xlu0 %v575_v35  ;;  %v1739_v37 = vpop.f32.mrb[13].mxu0 }
 0x4ca   :  { %v568_v39 = vpop.f32.mrb[14].mxu0 }
 0x4cb   :  { %v1740_v40 = vpop.f32.mrb[15].mxu0  ;;  %v574_v41 = vsel %vm243_vm5, %v572_v36, -1000000.0 }
 0x4cc   :  { %v578_v42 = vsel %vm349_vm4, %v574_v41, -inf }
 0x4cd   :  { %579 = vmax.xlane.f32.xlu1 %v578_v42 }
 0x4de   :  { %599 = vrot.lane.b32.xlu1 %v2301_v10, %s2133_s1 }
 0x556   :  { %v577_v43 = vpop.xlane.xlu0 %576 }
 0x557   :  { %v581_v44 = vsub.f32 %v573_v31, %v577_v43 }
 0x559   :  { %v583_v45 = vmul.f32 1.442695, %v581_v44 }
 0x55a   :  { %v580_v46 = vpop.xlane.xlu1 %579 }
 0x55b   :  { %1889 = vpow2.f32 %v583_v45  ;;  %v582_v47 = vsub.f32 %v574_v41, %v580_v46 }
 0x55d   :  { %v585_v48 = vmul.f32 1.442695, %v582_v47 }
 0x55e   :  { %v600_v49 = vpop.permute.xlu1 %599 }
 0x55f   :  { %1891 = vpow2.f32 %v585_v48  ;;  %v605_v50 = vsel %vm379_vm6, %v600_v49, 0 }
 0x560   :  { %1742 = vmatpush3.bf16.msra.mxu1 %v605_v50 }
 0x561   :  { %1753 = vmatprep.subr.bf16.mxu1 %v2127_v8 }
 0x565   :  { %v1890_v51 = vpop.eup %1889 }
 0x566   :  { %v587_v52 = vsel %vm349_vm4, %v1890_v51, 0.0 }
 0x567   :  { %588 = vadd.xlane.f32.xlu0 %v587_v52 }
 0x569   :  { %v1892_v53 = vpop.eup %1891 }
 0x56a   :  { %v590_v54 = vsel %vm349_vm4, %v1892_v53, 0.0 }
 0x56b   :  { %591 = vadd.xlane.f32.xlu0 %v590_v54 }
 0x581   :  { %647 = vrot.lane.b32.xlu0 %v2309_v18, %s2133_s1 }
 0x585   :  { %816 = vrot.lane.b32.xlu0 %v2309_v18, %s2134_s27 }
 0x5f4   :  { %v589_v55 = vpop.xlane.xlu0 %588 }
 0x5f5   :  { %1893 = vrcp.f32 %v589_v55 }
 0x5f8   :  { %v592_v56 = vpop.xlane.xlu0 %591 }
 0x5f9   :  { %1895 = vrcp.f32 %v592_v56 }
 0x5fc   :  { %v648_v57 = vpop.permute.xlu0 %647 }
 0x5fd   :  { %v653_v58 = vsel %vm379_vm6, %v648_v57, 0 }
 0x5fe   :  { %1748 = vmatpush3.bf16.msra.mxu0 %v653_v58 }
 0x5ff   :  { %v1894_v59 = vpop.eup %1893  ;;  %1761 = vmatprep.subr.bf16.mxu0 %v2127_v8 }
 0x600   :  { %v595_v60 = vmul.f32 %v1894_v59, %v1890_v51  ;;  %v817_v14 = vpop.permute.xlu0 %816 }
 0x602   :  { %v597_v61 = vpack.c.bf16 %v595_v60, %v595_v60 }
 0x603   :  { %v1896_v62 = vpop.eup %1895 }
 0x604   :  { %v596_v0 = vmul.f32 %v1896_v62, %v1892_v53  ;;  %1744 = vmatmul.mubr.msk.bf16.vlgmr.msra.gmra.mrb[12].mxu1 %vm349_vm4, %v597_v61 }
 0x605   :  { %1757 = vmatprep.mubr.msk.bf16.mxu1 %vm2128_vm1, %v2127_v8  ;;  %1754 = vmatpush3.bf16.msra.mxu1 %v1873_v11 }
 0x606   :  { %v598_v1 = vpack.c.bf16 %v596_v0, %v596_v0  ;;  %1755 = vmatprep.subr.bf16.mxu1 %v2127_v8 }
 0x608   :  { %1750 = vmatmul.mubr.msk.bf16.vlgmr.msra.gmra.mrb[16].mxu0 %vm349_vm4, %v598_v1 }
 0x609   :  { %1762 = vmatpush3.bf16.xpose.msra.mxu0 %v774_v2  ;;  %1763 = vmatprep.mubr.msk.bf16.mxu0 %vm2128_vm1, %v2127_v8 }
 0x60a   :  { %1773 = vmatprep.subr.bf16.mxu0 %v2127_v8  ;;  %1756 = vmatpush3.bf16.msra.mxu1 %v1874_v3 }
 0x60b   :  { %1767 = vmatprep.subr.bf16.mxu1 %v2127_v8 }
 0x6d7   :  { %v641_v4 = vpop.f32.mrb[12].mxu1 }
 0x6d8   :  { %v1745_v5 = vpop.f32.mrb[13].mxu1 }
 0x6d9   :  { %v644_v6 = vpop.f32.mrb[14].mxu1 }
 0x6da   :  { %v1746_v7 = vpop.f32.mrb[15].mxu1 }
 0x6db   :  { %v689_v9 = vpop.f32.mrb[16].mxu0 }
 0x6dc   :  { %v1856_v12 = vpack.i.bf16 %v689_v9, %v641_v4  ;;  %v1751_v13 = vpop.f32.mrb[17].mxu0 }
 0x6dd   :  { %v692_v15 = vpop.f32.mrb[18].mxu0 }
 0x6de   :  { %1857 = vrot.lane.b32.xlu1 %v1856_v12, %s2135_s28  ;;  %v1752_v16 = vpop.f32.mrb[19].mxu0 }
 0x6e2   :  { %768 = vrot.lane.b32.xlu1 %v2301_v10, %s2134_s27 }
 0x750   :  { %v1858_v19 = vpop.permute.xlu1 %1857 }
 0x751   :  { %v1860_v20 = vunpack.i.h.bf16 %v1858_v19  ;;  %v1859_v21 = vunpack.i.l.bf16 %v1858_v19 }
 0x753   :  { %v704_v24 = vsel %vm249_vm2, %v2382_v22, %v1860_v20  ;;  %v703_v25 = vsel %vm249_vm2, %v2380_v17, %v1859_v21 }
 0x754   :  { %v705_v26 = vpack.c.bf16 %v704_v24, %v703_v25  ;;  %v769_v27 = vpop.permute.xlu1 %768 }
 0x755   :  { %1764 = vmatmul.mubr.msk.bf16.vlgmr.msra.gmra.mrb[20].mxu0 %vm249_vm2, %v769_v27 }
 0x756   :  { %1758 = vmatmul.mubr.msk.bf16.vlgmr.msra.gmra.mrb[16].mxu1 %vm156_vm0, %v705_v26  ;;  %1775 = vmatprep.mubr.msk.bf16.mxu0 %vm2128_vm1, %v2127_v8 }
 0x757   :  { %1768 = vmatpush3.bf16.xpose.msra.mxu1 %v822_v28  ;;  %1769 = vmatprep.mubr.msk.bf16.mxu1 %vm2128_vm1, %v2127_v8 }
 0x758   :  { %1779 = vmatprep.subr.bf16.mxu1 %v2127_v8 }
 0x75e   :  { %1770 = vmatmul.mubr.msk.bf16.vlgmr.msra.gmra.mrb[20].mxu1 %vm249_vm2, %v817_v14 }
 0x75f   :  { %1781 = vmatprep.mubr.msk.bf16.mxu1 %vm2128_vm1, %v2127_v8 }
 0x828   :  { %v810_v17 = vpop.f32.mrb[20].mxu0 }
 0x829   :  { %v864_v22 = vmul.f32 0.25, %v810_v17  ;;  %v2440_v29 = vpop.f32.mrb[16].mxu1  ;;  %v1765_v30 = vpop.f32.mrb[21].mxu0 }
 0x82a   :  { %v1759_v31 = vpop.f32.mrb[17].mxu1  ;;  %v813_v34 = vpop.f32.mrb[22].mxu0 }
 0x82b   :  { %v2442_v35 = vpop.f32.mrb[18].mxu1  ;;  %v1766_v36 = vpop.f32.mrb[23].mxu0  ;;  %v866_v37 = vsel %vm242_vm3, %v864_v22, -1000000.0 }
 0x82c   :  { %v1760_v39 = vpop.f32.mrb[19].mxu1  ;;  %v868_v40 = vsel %vm349_vm4, %v866_v37, -inf }
 0x82d   :  { %869 = vmax.xlane.f32.xlu1 %v868_v40 }
 0x831   :  { %v858_v41 = vpop.f32.mrb[20].mxu1 }
 0x832   :  { %v865_v42 = vmul.f32 0.25, %v858_v41  ;;  %v1771_v43 = vpop.f32.mrb[21].mxu1 }
 0x833   :  { %v861_v44 = vpop.f32.mrb[22].mxu1 }
 0x834   :  { %v1772_v45 = vpop.f32.mrb[23].mxu1  ;;  %v867_v46 = vsel %vm243_vm5, %v865_v42, -1000000.0 }
 0x835   :  { %v871_v47 = vsel %vm349_vm4, %v867_v46, -inf }
 0x836   :  { %872 = vmax.xlane.f32.xlu0 %v871_v47 }
 0x83e   :  { %942 = vrot.lane.b32.xlu1 %v2422_v23, %s2129_s7 }
 0x8ba   :  { %v870_v48 = vpop.xlane.xlu1 %869 }
 0x8bb   :  { %v874_v49 = vsub.f32 %v866_v37, %v870_v48 }
 0x8bd   :  { %v876_v50 = vmul.f32 1.442695, %v874_v49 }
 0x8be   :  { %v943_v51 = vpop.permute.xlu1 %942 }
 0x8bf   :  { %1897 = vpow2.f32 %v876_v50  ;;  %v948_v52 = vsel %vm379_vm6, %v943_v51, 0 }
 0x8c0   :  { %1780 = vmatpush3.bf16.msra.mxu1 %v948_v52 }
 0x8c1   :  { %1791 = vmatprep.subr.bf16.mxu1 %v2127_v8 }
 0x8c3   :  { %v873_v53 = vpop.xlane.xlu0 %872 }
 0x8c4   :  { %v875_v54 = vsub.f32 %v867_v46, %v873_v53 }
 0x8c6   :  { %v878_v55 = vmul.f32 1.442695, %v875_v54 }
 0x8c8   :  { %1899 = vpow2.f32 %v878_v55 }
 0x8c9   :  { %v1898_v56 = vpop.eup %1897 }
 0x8ca   :  { %v880_v57 = vsel %vm349_vm4, %v1898_v56, 0.0 }
 0x8cb   :  { %881 = vadd.xlane.f32.xlu0 %v880_v57 }
 0x8d2   :  { %v1900_v58 = vpop.eup %1899 }
 0x8d3   :  { %v883_v59 = vsel %vm349_vm4, %v1900_v58, 0.0 }
 0x8d4   :  { %884 = vadd.xlane.f32.xlu1 %v883_v59  ;;  %v1875_v59 = vld [vmem:[#allocation8 + $0x10] sm:$0xff]  }
 0x8e1   :  { %893 = vrot.lane.b32.xlu0 %v2404_v63, %s2129_s7 }
 0x8e5   :  { %992 = vrot.lane.b32.xlu1 %v2404_v63, %s2132_s12  ;;  %1042 = vrot.lane.b32.xlu0 %v2422_v23, %s2132_s12 }
 0x8e9   :  { %990 = vrot.lane.b32.xlu1 %v2301_v10, %s2135_s28  ;;  %1040 = vrot.lane.b32.xlu0 %v2309_v18, %s2135_s28 }
 0x958   :  { %v882_v60 = vpop.xlane.xlu0 %881 }
 0x959   :  { %1901 = vrcp.f32 %v882_v60 }
 0x95c   :  { %v894_v61 = vpop.permute.xlu0 %893 }
 0x95d   :  { %v899_v62 = vsel %vm379_vm6, %v894_v61, 0  ;;  %v1876_v61 = vld [vmem:[#allocation8 + $0x18] sm:$0xff]  }
 0x95e   :  { %1774 = vmatpush3.bf16.msra.mxu0 %v899_v62 }
 0x95f   :  { %1785 = vmatprep.subr.bf16.mxu0 %v2127_v8 }
 0x960   :  { %v1043_v5 = vpop.permute.xlu0 %1042 }
 0x961   :  { %v885_v0 = vpop.xlane.xlu1 %884  ;;  %v1048_v9 = vsel %vm249_vm2, %v1043_v5, 0 }
 0x962   :  { %1903 = vrcp.f32 %v885_v0 }
 0x963   :  { %v1902_v1 = vpop.eup %1901 }
 0x964   :  { %v888_v2 = vmul.f32 %v1902_v1, %v1898_v56  ;;  %v1041_v12 = vpop.permute.xlu0 %1040 }
 0x965   :  { %v993_v11 = vpop.permute.xlu1 %992 }
 0x966   :  { %v998_v3 = vsel %vm249_vm2, %v993_v11, 0  ;;  %v890_v4 = vpack.c.bf16 %v888_v2, %v888_v2 }
 0x968   :  { %1776 = vmatmul.mubr.msk.bf16.vlgmr.msra.gmra.mrb[24].mxu0 %vm349_vm4, %v890_v4 }
 0x969   :  { %1786 = vmatpush3.bf16.xpose.msra.mxu0 %v998_v3  ;;  %1787 = vmatprep.mubr.msk.bf16.mxu0 %vm2128_vm1, %v2127_v8  ;;  %v991_v6 = vpop.permute.xlu1 %990 }
 0x96a   :  { %1797 = vmatprep.subr.bf16.mxu0 %v2127_v8 }
 0x96c   :  { %v1904_v10 = vpop.eup %1903 }
 0x96d   :  { %v889_v18 = vmul.f32 %v1904_v10, %v1900_v58 }
 0x96f   :  { %v891_v7 = vpack.c.bf16 %v889_v18, %v889_v18 }
 0x970   :  { %1788 = vmatmul.mubr.msk.bf16.vlgmr.msra.gmra.mrb[28].mxu0 %vm249_vm2, %v991_v6 }
 0x971   :  { %1782 = vmatmul.mubr.msk.bf16.vlgmr.msra.gmra.mrb[24].mxu1 %vm349_vm4, %v891_v7  ;;  %1799 = vmatprep.mubr.msk.bf16.mxu0 %vm2128_vm1, %v2127_v8 }
 0x972   :  { %1792 = vmatpush3.bf16.xpose.msra.mxu1 %v1048_v9  ;;  %1793 = vmatprep.mubr.msk.bf16.mxu1 %vm2128_vm1, %v2127_v8 }
 0x973   :  { %1803 = vmatprep.subr.bf16.mxu1 %v2127_v8 }
 0x979   :  { %1794 = vmatmul.mubr.msk.bf16.vlgmr.msra.gmra.mrb[28].mxu1 %vm249_vm2, %v1041_v12 }
 0x97a   :  { %1805 = vmatprep.mubr.msk.bf16.mxu1 %vm2128_vm1, %v2127_v8 }
 0xa3b   :  { %v2486_v13 = vpop.f32.mrb[24].mxu0 }
 0xa3c   :  { %v1777_v15 = vpop.f32.mrb[25].mxu0 }
 0xa3d   :  { %v938_v16 = vpop.f32.mrb[26].mxu0  ;;  %v1349_v15 = vld [vmem:[#allocation9 + $0x10] sm:$0xff] }
 0xa3e   :  { %v1778_v19 = vpop.f32.mrb[27].mxu0  ;;  %v1286_v16 = vld [vmem:[#allocation9] sm:$0xff] }
 0xa3f   :  { %v1353_v19 = vld [vmem:[#allocation11 + $0x10] sm:$0xff] }
 0xa43   :  { %v1034_v20 = vpop.f32.mrb[28].mxu0 }
 0xa44   :  { %v1090_v21 = vmul.f32 0.25, %v1034_v20  ;;  %v2488_v24 = vpop.f32.mrb[24].mxu1  ;;  %v1789_v25 = vpop.f32.mrb[29].mxu0  ;;  %v1317_v20 = vld [vmem:[#allocation9 + $0x8] sm:$0xff] }
 0xa45   :  { %v1783_v26 = vpop.f32.mrb[25].mxu1  ;;  %v1037_v27 = vpop.f32.mrb[30].mxu0  ;;  %v1289_v25 = vld [vmem:[#allocation11] sm:$0xff] }
 0xa46   :  { %v987_v28 = vpop.f32.mrb[26].mxu1  ;;  %v1790_v14 = vpop.f32.mrb[31].mxu0  ;;  %v1092_v17 = vsel %vm242_vm3, %v1090_v21, -1000000.0  ;;  %v1381_v21 = vld [vmem:[#allocation9 + $0x18] sm:$0xff]  ;;  %v1321_v26 = vld [vmem:[#allocation11 + $0x8] sm:$0xff] }
 0xa47   :  { %v1784_v22 = vpop.f32.mrb[27].mxu1  ;;  %v1094_v30 = vsel %vm349_vm4, %v1092_v17, -inf  ;;  %v1385_v27 = vld [vmem:[#allocation11 + $0x18] sm:$0xff]  ;;  %v1318_v14 = vmul.f32 %v1317_v20, %v2440_v29 }
 0xa48   :  { %1095 = vmax.xlane.f32.xlu1 %v1094_v30 }
 0xa4c   :  { %v1084_v31 = vpop.f32.mrb[28].mxu1 }
 0xa4d   :  { %v1091_v34 = vmul.f32 0.25, %v1084_v31  ;;  %v1795_v36 = vpop.f32.mrb[29].mxu1 }
 0xa4e   :  { %v1087_v37 = vpop.f32.mrb[30].mxu1 }
 0xa4f   :  { %v1796_v39 = vpop.f32.mrb[31].mxu1  ;;  %v1093_v40 = vsel %vm243_vm5, %v1091_v34, -1000000.0 }
 0xa50   :  { %v1097_v41 = vsel %vm349_vm4, %v1093_v40, -inf  ;;  %v1288_v39 = vmul.f32 %v1286_v16, %v2442_v35 }
 0xa51   :  { %1098 = vmax.xlane.f32.xlu0 %v1097_v41  ;;  %v1351_v41 = vmul.f32 %v1349_v15, %v2442_v35 }
 0xad5   :  { %v1096_v42 = vpop.xlane.xlu1 %1095 }
 0xad6   :  { %v1100_v43 = vsub.f32 %v1092_v17, %v1096_v42  ;;  %v1382_v17 = vmul.f32 %v1381_v21, %v2440_v29  ;;  %v1383_v42 = vmul.f32 %v1381_v21, %v2442_v35 }
 0xad8   :  { %v1102_v33 = vmul.f32 1.442695, %v1100_v43 }
 0xada   :  { %1905 = vpow2.f32 %v1102_v33 }
 0xade   :  { %v1099_v44 = vpop.xlane.xlu0 %1098 }
 0xadf   :  { %v1101_v45 = vsub.f32 %v1093_v40, %v1099_v44  ;;  %v1319_v40 = vmul.f32 %v1317_v20, %v2442_v35 }
 0xae1   :  { %v1104_v46 = vmul.f32 1.442695, %v1101_v45 }
 0xae3   :  { %1907 = vpow2.f32 %v1104_v46 }
 0xae4   :  { %v1906_v47 = vpop.eup %1905 }
 0xae5   :  { %v1106_v48 = vsel %vm349_vm4, %v1906_v47, 0.0 }
 0xae6   :  { %1107 = vadd.xlane.f32.xlu0 %v1106_v48 }
 0xaed   :  { %v1908_v49 = vpop.eup %1907 }
 0xaee   :  { %v1109_v50 = vsel %vm349_vm4, %v1908_v49, 0.0 }
 0xaef   :  { %1110 = vadd.xlane.f32.xlu1 %v1109_v50 }
 0xafc   :  { %1118 = vrot.lane.b32.xlu0 %v2404_v63, %s2131_s0 }
 0xb00   :  { %1166 = vrot.lane.b32.xlu1 %v2422_v23, %s2131_s0 }
 0xb73   :  { %v1108_v32 = vpop.xlane.xlu0 %1107 }
 0xb74   :  { %1909 = vrcp.f32 %v1108_v32 }
 0xb77   :  { %v1119_v38 = vpop.permute.xlu0 %1118 }
 0xb78   :  { %v1124_v51 = vsel %vm379_vm6, %v1119_v38, 0 }
 0xb79   :  { %1798 = vmatpush3.bf16.msra.mxu0 %v1124_v51 }
 0xb7a   :  { %1809 = vmatprep.subr.bf16.mxu0 %v2127_v8 }
 0xb7c   :  { %v1111_v52 = vpop.xlane.xlu1 %1110 }
 0xb7d   :  { %1911 = vrcp.f32 %v1111_v52 }
 0xb7e   :  { %v1910_v53 = vpop.eup %1909 }
 0xb7f   :  { %v1114_v54 = vmul.f32 %v1910_v53, %v1906_v47 }
 0xb80   :  { %v1167_v55 = vpop.permute.xlu1 %1166 }
 0xb81   :  { %v1172_v56 = vsel %vm379_vm6, %v1167_v55, 0  ;;  %v1116_v57 = vpack.c.bf16 %v1114_v54, %v1114_v54 }
 0xb82   :  { %1804 = vmatpush3.bf16.msra.mxu1 %v1172_v56 }
 0xb83   :  { %1800 = vmatmul.mubr.msk.bf16.vlgmr.msra.gmra.mrb[32].mxu0 %vm349_vm4, %v1116_v57  ;;  %1817 = vmatprep.subr.bf16.mxu1 %v2127_v8 }
 0xb84   :  { %1813 = vmatprep.mubr.msk.bf16.mxu0 %vm2128_vm1, %v2127_v8  ;;  %1810 = vmatpush3.bf16.msra.mxu0 %v1875_v59  ;;  %v1877_v59 = vld [vmem:[#allocation13] sm:$0xff]  }
 0xb85   :  { %1811 = vmatprep.subr.bf16.mxu0 %v2127_v8 }
 0xb87   :  { %v1912_v63 = vpop.eup %1911 }
 0xb88   :  { %v1115_v23 = vmul.f32 %v1912_v63, %v1908_v49  ;;  %1812 = vmatpush3.bf16.msra.mxu0 %v1876_v61  ;;  %v1879_v61 = vld [vmem:[#allocation13 + $0x10] sm:$0xff]  }
 0xb89   :  { %1825 = vmatprep.subr.bf16.mxu0 %v2127_v8 }
 0xb8a   :  { %v1117_v58 = vpack.c.bf16 %v1115_v23, %v1115_v23 }
 0xb8c   :  { %1806 = vmatmul.mubr.msk.bf16.vlgmr.msra.gmra.mrb[32].mxu1 %vm349_vm4, %v1117_v58 }
 0xb8d   :  { %1821 = vmatprep.mubr.msk.bf16.mxu1 %vm2128_vm1, %v2127_v8  ;;  %1818 = vmatpush3.bf16.msra.mxu1 %v1879_v61 }
 0xb8e   :  { %1819 = vmatprep.subr.bf16.mxu1 %v2127_v8 }
 0xc56   :  { %v1160_v60 = vpop.f32.mrb[32].mxu0 }
 0xc57   :  { %v1801_v62 = vpop.f32.mrb[33].mxu0 }
 0xc58   :  { %v1163_v0 = vpop.f32.mrb[34].mxu0  ;;  %v1880_v62 = vld [vmem:[#allocation13 + $0x18] sm:$0xff]  }
 0xc59   :  { %v1802_v1 = vpop.f32.mrb[35].mxu0  ;;  %1820 = vmatpush3.bf16.msra.mxu1 %v1880_v62 }
 0xc5f   :  { %v1208_v2 = vpop.f32.mrb[32].mxu1 }
 0xc60   :  { %v1861_v11 = vpack.i.bf16 %v1208_v2, %v1160_v60  ;;  %v1807_v3 = vpop.f32.mrb[33].mxu1  ;;  %v1878_v60 = vld [vmem:[#allocation13 + $0x8] sm:$0xff]  }
 0xc61   :  { %v1211_v4 = vpop.f32.mrb[34].mxu1 }
 0xc62   :  { %v1808_v10 = vpop.f32.mrb[35].mxu1  ;;  %1862 = vrot.lane.b32.xlu1 %v1861_v11, %s2135_s28 }
 0xcd4   :  { %v1863_v18 = vpop.permute.xlu1 %1862 }
 0xcd5   :  { %v1865_v5 = vunpack.i.h.bf16 %v1863_v18  ;;  %v1864_v6 = vunpack.i.l.bf16 %v1863_v18 }
 0xcd7   :  { %v1223_v7 = vsel %vm249_vm2, %v2488_v24, %v1865_v5  ;;  %v1222_v9 = vsel %vm249_vm2, %v2486_v13, %v1864_v6  ;;  %v1350_v24 = vmul.f32 %v1349_v15, %v2440_v29  ;;  %v1287_v13 = vmul.f32 %v1286_v16, %v2440_v29 }
 0xcd8   :  { %v1224_v12 = vpack.c.bf16 %v1223_v7, %v1222_v9 }
 0xcda   :  { %1814 = vmatmul.mubr.msk.bf16.vlgmr.msra.gmra.mrb[36].mxu0 %vm156_vm0, %v1224_v12 }
 0xcdb   :  { %1829 = vmatprep.mubr.msk.bf16.mxu0 %vm2128_vm1, %v2127_v8  ;;  %1826 = vmatpush3.bf16.msra.mxu0 %v1877_v59 }
 0xcdc   :  { %1827 = vmatprep.subr.bf16.mxu0 %v2127_v8 }
 0xcdf   :  { %1828 = vmatpush3.bf16.msra.mxu0 %v1878_v60 }
 0xdad   :  { %v2524_v28 = vpop.f32.mrb[36].mxu0 }
 0xdae   :  { %v1815_v22 = vpop.f32.mrb[37].mxu0  ;;  %v1354_v30 = vmul.f32 %v1353_v19, %v2524_v28  ;;  %v1290_v31 = vmul.f32 %v1289_v25, %v2524_v28  ;;  %v1322_v34 = vmul.f32 %v1321_v26, %v2524_v28  ;;  %v1386_v36 = vmul.f32 %v1385_v27, %v2524_v28 }
 0xdaf   :  { %v2534_v37 = vpop.f32.mrb[38].mxu0 }
 0xdb0   :  { %v1816_v43 = vpop.f32.mrb[39].mxu0  ;;  %v1356_v33 = vadd.f32 %v1354_v30, %v1350_v24  ;;  %v1292_v44 = vadd.f32 %v1290_v31, %v1287_v13  ;;  %v1324_v45 = vadd.f32 %v1322_v34, %v1318_v14  ;;  %v1291_v46 = vmul.f32 %v1289_v25, %v2534_v37 }
 0xdb1   :  { %v1323_v47 = vmul.f32 %v1321_v26, %v2534_v37  ;;  %v1388_v48 = vadd.f32 %v1386_v36, %v1382_v17  ;;  %v1355_v49 = vmul.f32 %v1353_v19, %v2534_v37  ;;  %v1387_v50 = vmul.f32 %v1385_v27, %v2534_v37 }
 0xdb2   :  { %v1358_v32 = vsel %vm156_vm0, %v1356_v33, 0.0  ;;  %v1294_v38 = vsel %vm156_vm0, %v1292_v44, 0.0  ;;  %v1293_v51 = vadd.f32 %v1291_v46, %v1288_v39  ;;  %v1326_v55 = vsel %vm156_vm0, %v1324_v45, 0.0 }
 0xdb3   :  { %1359 = vadd.xlane.f32.xlu1 %v1358_v32  ;;  %1295 = vadd.xlane.f32.xlu0 %v1294_v38  ;;  %v1325_v52 = vadd.f32 %v1323_v47, %v1319_v40  ;;  %v1357_v53 = vadd.f32 %v1355_v49, %v1351_v41  ;;  %v1389_v54 = vadd.f32 %v1387_v50, %v1383_v42  ;;  %v1390_v63 = vsel %vm156_vm0, %v1388_v48, 0.0 }
 0xdb4   :  { %v1297_v56 = vsel %vm156_vm0, %v1293_v51, 0.0  ;;  %v1313_v17 = vstv %s2554_s29  ;;  %v1345_v39 = vstv %s2556_s30  ;;  %v1377_v45 = vstv %s2558_s3 }
 0xdb5   :  { %v1329_v57 = vsel %vm156_vm0, %v1325_v52, 0.0  ;;  %v1361_v23 = vsel %vm156_vm0, %v1357_v53, 0.0  ;;  %v1393_v58 = vsel %vm156_vm0, %v1389_v54, 0.0 }
 0xdb7   :  { %1327 = vadd.xlane.f32.xlu0 %v1326_v55  ;;  %1298 = vadd.xlane.f32.xlu1 %v1297_v56 }
 0xdbb   :  { %1330 = vadd.xlane.f32.xlu0 %v1329_v57  ;;  %1391 = vadd.xlane.f32.xlu1 %v1390_v63  ;;  %v1409_v57 = vstv %s2560_s6 }
 0xdbf   :  { %1362 = vadd.xlane.f32.xlu0 %v1361_v23 }
 0xdc3   :  { %1394 = vadd.xlane.f32.xlu0 %v1393_v58 }
 0xe40   :  { %v1360_v0 = vpop.xlane.xlu1 %1359  ;;  %v1296_v1 = vpop.xlane.xlu0 %1295 }
 0xe41   :  { %v1364_v2 = vrot.slane %v1360_v0, 4  ;;  %v1300_v11 = vrot.slane %v1296_v1, 4 }
 0xe43   :  { %v1365_v3 = vadd.f32 %v1364_v2, %v1360_v0  ;;  %v1301_v4 = vadd.f32 %v1300_v11, %v1296_v1 }
 0xe44   :  { %v1328_v10 = vpop.xlane.xlu0 %1327  ;;  %v1299_v18 = vpop.xlane.xlu1 %1298 }
 0xe45   :  { %v1366_v5 = vrot.slane %v1365_v3, 2  ;;  %v1302_v6 = vrot.slane %v1301_v4, 2  ;;  %v1332_v7 = vrot.slane %v1328_v10, 4  ;;  %v1306_v9 = vrot.slane %v1299_v18, 4 }
 0xe47   :  { %v1303_v12 = vadd.f32 %v1302_v6, %v1301_v4  ;;  %v1333_v8 = vadd.f32 %v1332_v7, %v1328_v10  ;;  %v1307_v15 = vadd.f32 %v1306_v9, %v1299_v18  ;;  %v1367_v20 = vadd.f32 %v1366_v5, %v1365_v3 }
 0xe48   :  { %v1331_v16 = vpop.xlane.xlu0 %1330  ;;  %v1392_v19 = vpop.xlane.xlu1 %1391 }
 0xe49   :  { %v1304_v21 = vrot.slane %v1303_v12, 1  ;;  %v1334_v25 = vrot.slane %v1333_v8, 2  ;;  %v1308_v26 = vrot.slane %v1307_v15, 2  ;;  %v1338_v27 = vrot.slane %v1331_v16, 4 }
 0xe4a   :  { %v1396_v24 = vrot.slane %v1392_v19, 4  ;;  %v1368_v34 = vrot.slane %v1367_v20, 1 }
 0xe4b   :  { %v1335_v13 = vadd.f32 %v1334_v25, %v1333_v8  ;;  %v1309_v14 = vadd.f32 %v1308_v26, %v1307_v15  ;;  %v1339_v22 = vadd.f32 %v1338_v27, %v1331_v16  ;;  %v1305_v36 = vadd.f32 %v1304_v21, %v1303_v12 }
 0xe4c   :  { %v1397_v30 = vadd.f32 %v1396_v24, %v1392_v19  ;;  %v1363_v31 = vpop.xlane.xlu0 %1362  ;;  %v1369_v50 = vadd.f32 %v1368_v34, %v1367_v20 }
 0xe4d   :  { %v1336_v40 = vrot.slane %v1335_v13, 1  ;;  %v1310_v41 = vrot.slane %v1309_v14, 1  ;;  %v1340_v42 = vrot.slane %v1339_v22, 2  ;;  %v1370_v33 = vrot.slane %v1363_v31, 4 }
 0xe4e   :  { %v1398_v43 = vrot.slane %v1397_v30, 2  ;;  %v1314_v32 = vadd.f32 %v1313_v17, %v1305_v36  ;;  %v1378_v60 = vadd.f32 %v1377_v45, %v1369_v50 }
 0xe4f   :  { %v1337_v44 = vadd.f32 %v1336_v40, %v1335_v13  ;;  %v1341_v46 = vadd.f32 %v1340_v42, %v1339_v22  ;;  %v1371_v48 = vadd.f32 %v1370_v33, %v1363_v31  ;;  %v1311_v52 = vadd.f32 %v1310_v41, %v1309_v14 }
 0xe50   :  { %v1399_v47 = vadd.f32 %v1398_v43, %v1397_v30  ;;  %v1395_v49 = vpop.xlane.xlu0 %1394 }
 0xe51   :  { %v1346_v38 = vadd.f32 %v1345_v39, %v1337_v44  ;;  %v1402_v51 = vrot.slane %v1395_v49, 4  ;;  %v1342_v53 = vrot.slane %v1341_v46, 1  ;;  %v1372_v55 = vrot.slane %v1371_v48, 2 }
 0xe52   :  { %v1400_v54 = vrot.slane %v1399_v47, 1  ;;  %v1315_v1 = vadd.f32 %v1313_v17, %v1311_v52 }
 0xe53   :  { %v1412_v56 = vmax.f32 %v1314_v32, %v1346_v38  ;;  %v1403_v63 = vadd.f32 %v1402_v51, %v1395_v49  ;;  %v1343_v23 = vadd.f32 %v1342_v53, %v1341_v46  ;;  %v1373_v59 = vadd.f32 %v1372_v55, %v1371_v48 }
 0xe54   :  { %v1401_v58 = vadd.f32 %v1400_v54, %v1399_v47 }
 0xe55   :  { %v1414_v61 = vsub.f32 %v1314_v32, %v1412_v56  ;;  %v1420_v62 = vsub.f32 %v1346_v38, %v1412_v56  ;;  %v1404_v0 = vrot.slane %v1403_v63, 2  ;;  %v1347_v2 = vadd.f32 %v1345_v39, %v1343_v23 }
 0xe56   :  { %v1410_v11 = vadd.f32 %v1409_v57, %v1401_v58  ;;  %v1374_v3 = vrot.slane %v1373_v59, 1 }
 0xe57   :  { %v1416_v4 = vmul.f32 1.442695, %v1414_v61  ;;  %v1422_v10 = vmul.f32 1.442695, %v1420_v62  ;;  %v1405_v18 = vadd.f32 %v1404_v0, %v1403_v63  ;;  %v1413_v5 = vmax.f32 %v1315_v1, %v1347_v2 }
 0xe58   :  { %v1434_v6 = vmax.f32 %v1378_v60, %v1410_v11  ;;  %v1375_v7 = vadd.f32 %v1374_v3, %v1373_v59 }
 0xe59   :  { %1913 = vpow2.f32 %v1416_v4  ;;  %v1406_v9 = vrot.slane %v1405_v18, 1  ;;  %v1415_v12 = vsub.f32 %v1315_v1, %v1413_v5  ;;  %v1421_v8 = vsub.f32 %v1347_v2, %v1413_v5 }
 0xe5a   :  { %1915 = vpow2.f32 %v1422_v10  ;;  %v1436_v15 = vsub.f32 %v1378_v60, %v1434_v6  ;;  %v1442_v16 = vsub.f32 %v1410_v11, %v1434_v6  ;;  %v1379_v27 = vadd.f32 %v1377_v45, %v1375_v7  ;;  %v1660_v6 = vld [vmem:[%s2602_s8] ss:$0 sm:$0xff] }
 0xe5b   :  { %v1407_v19 = vadd.f32 %v1406_v9, %v1405_v18  ;;  %v1418_v20 = vmul.f32 1.442695, %v1415_v12  ;;  %v1424_v21 = vmul.f32 1.442695, %v1421_v8 }
 0xe5c   :  { %v1438_v25 = vmul.f32 1.442695, %v1436_v15  ;;  %v1444_v26 = vmul.f32 1.442695, %v1442_v16 }
 0xe5d   :  { %v1411_v24 = vadd.f32 %v1409_v57, %v1407_v19  ;;  %1917 = vpow2.f32 %v1418_v20 }
 0xe5e   :  { %1919 = vpow2.f32 %v1424_v21 }
 0xe5f   :  { %v1435_v13 = vmax.f32 %v1379_v27, %v1411_v24  ;;  %1921 = vpow2.f32 %v1438_v25 }
 0xe60   :  { %1923 = vpow2.f32 %v1444_v26 }
 0xe61   :  { %v1437_v14 = vsub.f32 %v1379_v27, %v1435_v13  ;;  %v1443_v17 = vsub.f32 %v1411_v24, %v1435_v13 }
 0xe63   :  { %v1914_v22 = vpop.eup %1913  ;;  %v1440_v30 = vmul.f32 1.442695, %v1437_v14  ;;  %v1446_v31 = vmul.f32 1.442695, %v1443_v17 }
 0xe64   :  { %v1916_v34 = vpop.eup %1915 }
 0xe65   :  { %v1426_v36 = vadd.f32 %v1916_v34, %v1914_v22  ;;  %1925 = vpow2.f32 %v1440_v30 }
 0xe66   :  { %1927 = vpow2.f32 %v1446_v31 }
 0xe67   :  { %1929 = vrcp.f32 %v1426_v36  ;;  %v1918_v39 = vpop.eup %1917 }
 0xe68   :  { %v1920_v40 = vpop.eup %1919 }
 0xe69   :  { %v1922_v41 = vpop.eup %1921  ;;  %v1427_v42 = vadd.f32 %v1920_v40, %v1918_v39 }
 0xe6a   :  { %v1924_v43 = vpop.eup %1923 }
 0xe6b   :  { %1931 = vrcp.f32 %v1427_v42  ;;  %v1448_v33 = vadd.f32 %v1924_v43, %v1922_v41 }
 0xe6d   :  { %1933 = vrcp.f32 %v1448_v33 }
 0xe6f   :  { %v1926_v44 = vpop.eup %1925 }
 0xe70   :  { %v1928_v45 = vpop.eup %1927 }
 0xe71   :  { %v1930_v46 = vpop.eup %1929  ;;  %v1449_v47 = vadd.f32 %v1928_v45, %v1926_v44 }
 0xe72   :  { %v1430_v48 = vmul.f32 %v1930_v46, %v1914_v22  ;;  %v1432_v49 = vmul.f32 %v1930_v46, %v1916_v34 }
 0xe73   :  { %1935 = vrcp.f32 %v1449_v47 }
 0xe74   :  { %v1456_v50 = vmul.f32 %v1430_v48, %v2440_v29  ;;  %v1458_v32 = vmul.f32 %v1432_v49, %v2524_v28 }
 0xe75   :  { %v1932_v38 = vpop.eup %1931 }
 0xe76   :  { %v1460_v51 = vadd.f32 %v1458_v32, %v1456_v50  ;;  %v1431_v52 = vmul.f32 %v1932_v38, %v1918_v39  ;;  %v1433_v53 = vmul.f32 %v1932_v38, %v1920_v40 }
 0xe77   :  { %v1934_v54 = vpop.eup %1933 }
 0xe78   :  { %v1457_v55 = vmul.f32 %v1431_v52, %v2442_v35  ;;  %v1459_v56 = vmul.f32 %v1433_v53, %v2534_v37  ;;  %v1452_v57 = vmul.f32 %v1934_v54, %v1922_v41  ;;  %v1454_v63 = vmul.f32 %v1934_v54, %v1924_v43 }
 0xe7a   :  { %v1461_v23 = vadd.f32 %v1459_v56, %v1457_v55  ;;  %v1462_v58 = vmul.f32 %v1452_v57, %v2440_v29  ;;  %v1464_v59 = vmul.f32 %v1454_v63, %v2524_v28 }
 0xe7c   :  { %v1468_v61 = vpack.c.bf16 %v1461_v23, %v1460_v51  ;;  %v1466_v62 = vadd.f32 %v1464_v59, %v1462_v58 }
 0xe7d   :  { %v1936_v60 = vpop.eup %1935 }
 0xe7e   :  { %v1453_v0 = vmul.f32 %v1936_v60, %v1926_v44  ;;  %v1455_v1 = vmul.f32 %v1936_v60, %v1928_v45  ;;  %1830 = vmatmul.mubr.msk.bf16.vlgmr.msra.gmra.mrb[40].mxu0 %vm156_vm0, %v1468_v61 }
 0xe80   :  { %v1463_v2 = vmul.f32 %v1453_v0, %v2442_v35  ;;  %v1465_v11 = vmul.f32 %v1455_v1, %v2534_v37 }
 0xe82   :  { %v1467_v3 = vadd.f32 %v1465_v11, %v1463_v2 }
 0xe84   :  { %v1469_v4 = vpack.c.bf16 %v1467_v3, %v1466_v62 }
 0xe86   :  { %1822 = vmatmul.mubr.msk.bf16.vlgmr.msra.gmra.mrb[36].mxu1 %vm156_vm0, %v1469_v4 }
 0xf51   :  { %v1584_v10 = vpop.f32.mrb[40].mxu0 }
 0xf52   :  { %v1831_v18 = vpop.f32.mrb[41].mxu0 }
 0xf53   :  { %v1587_v29 = vpop.f32.mrb[42].mxu0 }
 0xf54   :  { %v1832_v5 = vpop.f32.mrb[43].mxu0 }
 0xf59   :  { %v1528_v28 = vpop.f32.mrb[36].mxu1 }
 0xf5a   :  { %v1585_v7 = vadd.f32 %v1584_v10, %v1528_v28  ;;  %v1823_v9 = vpop.f32.mrb[37].mxu1 }
 0xf5b   :  { %v1531_v12 = vpop.f32.mrb[38].mxu1 }
 0xf5c   :  { %v1588_v35 = vadd.f32 %v1587_v29, %v1531_v12  ;;  %v1824_v37 = vpop.f32.mrb[39].mxu1  ;;  %v1598_v8 = vadd.f32 %v1660_v6, %v1585_v7 }
 0xf5e   :  { %v1599_v15 = vadd.f32 %v1660_v6, %v1588_v35  ;;  %1600 = vst [vmem:[#allocation15] sm:$0xff] %v1598_v8 }
 0xf60   :  { %1601 = vst [vmem:[#allocation15 + $0x8] sm:$0xff] %v1599_v15 }
 0xf61   :  { %2092 = shalt.err (!%p2089_p1)
}
 0xf62   :  { %s2093_s16 = scalar_lea.hbm %s2603_s9, 256 }
 0xf63   :  { %p2094_p2 = scmp.ne.s32.totalorder %s2603_s9, %s2093_s16  ;;  %p2097_p3 = scmp.lt.u32.totalorder %s2093_s16, %s2603_s9 }
 0xf65   :  { %p2099_p4 = pnand %p2097_p3, %p2094_p2 }
 0xf67   :  { %2102 = shalt.err (!%p2099_p4)
}
 0xf68   :  { %1613 = dma.vmem_to_hbm [thread:$0]  %s1608_s2, 256, %s2603_s9, [#allocation4], %s2117_s21, %s2117_s21, %s2118_s22  }
 0xf69   :  { %2113 = dma.done.wait [#allocation4], 256  }
 0xf6a   :  { %2114 = vsyncadd [#allocation4], 4294967040 }
 0xf6b   :  { %1617 = vsyncpa [#allocation3], 1 }
 0xf6c   :  { %1618 = vsyncpa [#allocation7], 1 }
 0xf6d   :  { %1619 = vsyncpa [#allocation10], 1 }
 0xf6e   :  { %1620 = vsyncpa [#allocation14], 1 }
 0xf6f   :  { %1621 = vsyncpa [#allocation4], 1 }
 0xf70   :  { %1622 = vsyncpa [#allocation5], 1 }

</bundles_post_ra>
